<compile_context>
chip_gen: v7x
topology: tpu7x:2x2x1
jax: 0.10.0
libtpu: 0.0.40
codegen_flags: <defaults>
</compile_context>

<pallas_src>
import functools

import jax
import jax.numpy as jnp
from jax import lax
from jax.experimental import pallas as pl
from jax.experimental.pallas import tpu as pltpu


# -----------------------------------------------------------------------------
# Fused kernel factory: embedded sequence -> stacked LSTM over T -> final FC.
# Ref layout:
#   x, (w_ih_0, w_hh_0, b_0), ..., (w_ih_{L-1}, w_hh_{L-1}, b_{L-1}),
#   fc_w, fc_b, out, h_n, c_n, proj_scratch, seq_scratch
# -----------------------------------------------------------------------------
def make_fused_kernel(num_layers, hidden_dim, seq_len, batch):
    L, H, T, B = num_layers, hidden_dim, seq_len, batch

    def kernel(*refs):
        x_ref = refs[0]                                     # (T*B, E) time-major
        wih_refs = [refs[1 + 3 * l] for l in range(L)]      # (E_l, 4H)
        whh_refs = [refs[2 + 3 * l] for l in range(L)]      # (H, 4H)
        b_refs = [refs[3 + 3 * l] for l in range(L)]        # (1, 4H)
        fc_w_ref = refs[1 + 3 * L]                          # (H, O)
        fc_b_ref = refs[2 + 3 * L]                          # (1, O)
        out_ref, hN_ref, cN_ref = refs[3 + 3 * L:6 + 3 * L]
        proj_ref, seq_ref = refs[6 + 3 * L:]                # (T*B,4H), (T*B,H)

        h_last = None
        for l in range(L):                                  # static layer-major loop
            # ---- Batched, non-recurrent input projection over all T steps ----
            x_in = x_ref[...] if l == 0 else seq_ref[...]   # (T*B, E_l)
            proj_ref[...] = jnp.dot(x_in, wih_refs[l][...],
                                    preferred_element_type=jnp.float32)
            w_hh = whh_refs[l][...]
            # Bias broadcast hoisted out of the (unrolled) time loop.
            b_bcast = jnp.broadcast_to(b_refs[l][...], (B, 4 * H))

            # ---- Serial recurrence: only h_{t-1} @ W_hh on the MXU chain ----
            def step(t, carry, w_hh=w_hh, b_bcast=b_bcast):
                h, c = carry
                rows = pl.ds(t * B, B)
                gates = (proj_ref[rows, :]
                         + jnp.dot(h, w_hh, preferred_element_type=jnp.float32)
                         + b_bcast)
                i_g = jax.nn.sigmoid(gates[:, 0 * H:1 * H])
                f_g = jax.nn.sigmoid(gates[:, 1 * H:2 * H])
                g_g = jnp.tanh(gates[:, 2 * H:3 * H])
                o_g = jax.nn.sigmoid(gates[:, 3 * H:4 * H])
                c_new = f_g * c + i_g * g_g
                h_new = o_g * jnp.tanh(c_new)
                # Layer output sequence feeds the next layer's batched projection.
                seq_ref[rows, :] = h_new
                return h_new, c_new

            h0 = jnp.zeros((B, H), jnp.float32)
            c0 = jnp.zeros((B, H), jnp.float32)
            # T static and small -> full unroll for LLO scheduler visibility.
            # TODO(synk): cap the unroll factor (e.g. 4) once T grows past ~16.
            h_last, c_last = lax.fori_loop(0, T, step, (h0, c0), unroll=True)

            # Final per-layer states written exactly once.
            hN_ref[l] = h_last
            cN_ref[l] = c_last

        # Final FC on outputs[:, -1, :] == last hidden state of the top layer.
        out_ref[...] = (jnp.dot(h_last, fc_w_ref[...],
                                preferred_element_type=jnp.float32)
                        + fc_b_ref[...])

    return kernel


# -----------------------------------------------------------------------------
# Full BaseModel forward.
# -----------------------------------------------------------------------------
def base_model_forward(params, x_ids, *, batch_first=True):
    # Embedding lookup (row gather) stays in plain JAX; gathering on transposed
    # ids yields the time-major layout directly (no activation transpose), and
    # the flatten to (T*B, E) is free in XLA.
    ids_tb = x_ids.T if batch_first else x_ids              # (T, B) int32
    x_tbe = jnp.take(params["embedding"], ids_tb, axis=0)   # (T, B, E) f32
    T, B, E = x_tbe.shape
    x_flat = x_tbe.reshape(T * B, E)                        # (T*B, E)

    L = len(params["lstm"])
    H, O = params["fc_w"].shape

    inputs = [x_flat]
    for layer in params["lstm"]:
        inputs += [layer["w_ih"], layer["w_hh"], layer["b"]]
    inputs += [params["fc_w"], params["fc_b"]]

    kernel = make_fused_kernel(L, H, T, B)

    vmem = pl.BlockSpec(memory_space=pltpu.MemorySpace.VMEM)
    out, h_n, c_n = pl.pallas_call(
        kernel,
        out_shape=(
            jax.ShapeDtypeStruct((B, O), jnp.float32),
            jax.ShapeDtypeStruct((L, B, H), jnp.float32),
            jax.ShapeDtypeStruct((L, B, H), jnp.float32),
        ),
        in_specs=[vmem for _ in inputs],
        out_specs=(vmem, vmem, vmem),
        scratch_shapes=[
            pltpu.VMEM((T * B, 4 * H), jnp.float32),   # batched gate projection
            pltpu.VMEM((T * B, H), jnp.float32),       # inter-layer hidden seq
        ],
        # NOTE: total VMEM usage here is ~100 KB, far below every chip's scoped
        # default.  At production H set vmem_limit_bytes explicitly (v5e scoped
        # default is 16 MiB) and stream per-layer weights instead.
    )(*inputs)
    return out, (h_n, c_n)


# -----------------------------------------------------------------------------
# Parameter init: weights stored pre-transposed as (in_features, 4H); W_ih and
# W_hh kept SEPARATE (batched input projection);  bias = b_ih + b_hh.
# -----------------------------------------------------------------------------
def init_params(key, input_size, output_size, embedding_dim, hidden_dim,
                num_layers):
    keys = jax.random.split(key, 1 + 4 * num_layers + 2)
    k_iter = iter(keys)
    scale = 1.0 / jnp.sqrt(hidden_dim)

    params = {}
    params["embedding"] = jax.random.normal(
        next(k_iter), (input_size, embedding_dim), jnp.float32)

    lstm_layers = []
    for l in range(num_layers):
        in_dim = embedding_dim if l == 0 else hidden_dim
        w_ih = jax.random.uniform(next(k_iter), (in_dim, 4 * hidden_dim),
                                  jnp.float32, -scale, scale)
        w_hh = jax.random.uniform(next(k_iter), (hidden_dim, 4 * hidden_dim),
                                  jnp.float32, -scale, scale)
        b_ih = jax.random.uniform(next(k_iter), (1, 4 * hidden_dim),
                                  jnp.float32, -scale, scale)
        b_hh = jax.random.uniform(next(k_iter), (1, 4 * hidden_dim),
                                  jnp.float32, -scale, scale)
        lstm_layers.append({
            "w_ih": w_ih,                                  # (in_dim, 4H)
            "w_hh": w_hh,                                  # (H, 4H)
            "b": b_ih + b_hh,                              # (1, 4H)
        })
    params["lstm"] = lstm_layers

    params["fc_w"] = jax.random.uniform(next(k_iter), (hidden_dim, output_size),
                                        jnp.float32, -scale, scale)
    params["fc_b"] = jax.random.uniform(next(k_iter), (1, output_size),
                                        jnp.float32, -scale, scale)
    return params


if __name__ == "__main__":
    # Small, module-consistent shapes.
    input_size = 16        # vocab size
    output_size = 16
    embedding_dim = 32
    hidden_dim = 32
    num_layers = 2
    batch_first = True
    B, T = 2, 8

    key = jax.random.PRNGKey(0)
    pkey, xkey = jax.random.split(key)
    params = init_params(pkey, input_size, output_size,
                         embedding_dim, hidden_dim, num_layers)
    x_ids = jax.random.randint(xkey, (B, T), 0, input_size, dtype=jnp.int32)

    fwd = jax.jit(functools.partial(base_model_forward,
                                    batch_first=batch_first))
    out, (h_n, c_n) = fwd(params, x_ids)
    jax.block_until_ready((out, h_n, c_n))

    assert out.shape == (B, output_size)
    assert h_n.shape == (num_layers, B, hidden_dim)
    assert c_n.shape == (num_layers, B, hidden_dim)
    assert bool(jnp.all(jnp.isfinite(out)))
    assert bool(jnp.all(jnp.isfinite(h_n))) and bool(jnp.all(jnp.isfinite(c_n)))
    print("KERNEL_OK")
</pallas_src>

<mosaic_0001>
module attributes {stable_mosaic.version = 11 : i64} {
  func.func @kernel(%arg0: memref<16x32xf32, #tpu.memory_space<vmem>>, %arg1: memref<32x128xf32, #tpu.memory_space<vmem>>, %arg2: memref<32x128xf32, #tpu.memory_space<vmem>>, %arg3: memref<1x128xf32, #tpu.memory_space<vmem>>, %arg4: memref<32x128xf32, #tpu.memory_space<vmem>>, %arg5: memref<32x128xf32, #tpu.memory_space<vmem>>, %arg6: memref<1x128xf32, #tpu.memory_space<vmem>>, %arg7: memref<32x16xf32, #tpu.memory_space<vmem>>, %arg8: memref<1x16xf32, #tpu.memory_space<vmem>>, %arg9: memref<2x16xf32, #tpu.memory_space<vmem>>, %arg10: memref<2x2x32xf32, #tpu.memory_space<vmem>>, %arg11: memref<2x2x32xf32, #tpu.memory_space<vmem>>, %arg12: memref<16x128xf32, #tpu.memory_space<vmem>>, %arg13: memref<16x32xf32, #tpu.memory_space<vmem>>) attributes {dimension_semantics = [], scalar_prefetch = 0 : i64, scratch_operands = 2 : i64, tpu.core_type = #tpu.core_type<tc>} {
    %c0 = arith.constant 0 : index
    %c0_0 = arith.constant 0 : index
    %0 = vector.load %arg0[%c0, %c0_0] : memref<16x32xf32, #tpu.memory_space<vmem>>, vector<16x32xf32>
    %c0_1 = arith.constant 0 : index
    %c0_2 = arith.constant 0 : index
    %1 = vector.load %arg1[%c0_1, %c0_2] : memref<32x128xf32, #tpu.memory_space<vmem>>, vector<32x128xf32>
    %cst = arith.constant dense<0.000000e+00> : vector<16x128xf32>
    %2 = tpu.matmul %0, %1, %cst {dimension_numbers = #tpu.dot_dimension_numbers<[1], [0], [0], [1], [0, 0, 1, 1], [], []>} : vector<16x32xf32>, vector<32x128xf32>, vector<16x128xf32> -> vector<16x128xf32>
    %c0_3 = arith.constant 0 : index
    %c0_4 = arith.constant 0 : index
    %3 = vector.load %arg12[%c0_3, %c0_4] : memref<16x128xf32, #tpu.memory_space<vmem>>, vector<16x128xf32>
    tpu.vector_store %arg12[%c0_3, %c0_4], %2 {strides = array<i32>} : memref<16x128xf32, #tpu.memory_space<vmem>>, vector<16x128xf32>,
    %c0_5 = arith.constant 0 : index
    %c0_6 = arith.constant 0 : index
    %4 = vector.load %arg2[%c0_5, %c0_6] : memref<32x128xf32, #tpu.memory_space<vmem>>, vector<32x128xf32>
    %c0_7 = arith.constant 0 : index
    %c0_8 = arith.constant 0 : index
    %5 = vector.load %arg3[%c0_7, %c0_8] : memref<1x128xf32, #tpu.memory_space<vmem>>, vector<1x128xf32>
    %6 = vector.shape_cast %5 : vector<1x128xf32> to vector<1x128xf32>
    %7 = vector.broadcast %6 : vector<1x128xf32> to vector<2x128xf32>
    %cst_9 = arith.constant 0.000000e+00 : f32
    %8 = vector.broadcast %cst_9 : f32 to vector<2x32xf32>
    %cst_10 = arith.constant 0.000000e+00 : f32
    %9 = vector.broadcast %cst_10 : f32 to vector<2x32xf32>
    %c0_i32 = arith.constant 0 : i32
    %c2_i32 = arith.constant 2 : i32
    %10 = arith.muli %c0_i32, %c2_i32 : i32
    %11 = arith.index_cast %10 : i32 to index
    %c0_11 = arith.constant 0 : index
    %12 = vector.load %arg12[%11, %c0_11] : memref<16x128xf32, #tpu.memory_space<vmem>>, vector<2x128xf32>
    %cst_12 = arith.constant dense<0.000000e+00> : vector<2x128xf32>
    %13 = tpu.matmul %8, %4, %cst_12 {dimension_numbers = #tpu.dot_dimension_numbers<[1], [0], [0], [1], [0, 0, 1, 1], [], []>} : vector<2x32xf32>, vector<32x128xf32>, vector<2x128xf32> -> vector<2x128xf32>
    %14 = arith.addf %12, %13 : vector<2x128xf32>
    %15 = arith.addf %14, %7 : vector<2x128xf32>
    %16 = vector.extract_strided_slice %15 {offsets = [0, 0], sizes = [2, 32], strides = [1, 1]} : vector<2x128xf32> to vector<2x32xf32>
    %17 = arith.negf %16 : vector<2x32xf32>
    %18 = math.exp %17 : vector<2x32xf32>
    %cst_13 = arith.constant 1.000000e+00 : f32
    %19 = vector.broadcast %cst_13 : f32 to vector<2x32xf32>
    %20 = arith.addf %19, %18 : vector<2x32xf32>
    %21 = arith.divf %19, %20 : vector<2x32xf32>
    %22 = vector.extract_strided_slice %15 {offsets = [0, 32], sizes = [2, 32], strides = [1, 1]} : vector<2x128xf32> to vector<2x32xf32>
    %23 = arith.negf %22 : vector<2x32xf32>
    %24 = math.exp %23 : vector<2x32xf32>
    %cst_14 = arith.constant 1.000000e+00 : f32
    %25 = vector.broadcast %cst_14 : f32 to vector<2x32xf32>
    %26 = arith.addf %25, %24 : vector<2x32xf32>
    %27 = arith.divf %25, %26 : vector<2x32xf32>
    %28 = vector.extract_strided_slice %15 {offsets = [0, 64], sizes = [2, 32], strides = [1, 1]} : vector<2x128xf32> to vector<2x32xf32>
    %29 = math.tanh %28 : vector<2x32xf32>
    %30 = vector.extract_strided_slice %15 {offsets = [0, 96], sizes = [2, 32], strides = [1, 1]} : vector<2x128xf32> to vector<2x32xf32>
    %31 = arith.negf %30 : vector<2x32xf32>
    %32 = math.exp %31 : vector<2x32xf32>
    %cst_15 = arith.constant 1.000000e+00 : f32
    %33 = vector.broadcast %cst_15 : f32 to vector<2x32xf32>
    %34 = arith.addf %33, %32 : vector<2x32xf32>
    %35 = arith.divf %33, %34 : vector<2x32xf32>
    %36 = arith.mulf %27, %9 : vector<2x32xf32>
    %37 = arith.mulf %21, %29 : vector<2x32xf32>
    %38 = arith.addf %36, %37 : vector<2x32xf32>
    %39 = math.tanh %38 : vector<2x32xf32>
    %40 = arith.mulf %35, %39 : vector<2x32xf32>
    %41 = arith.index_cast %10 : i32 to index
    %c0_16 = arith.constant 0 : index
    %42 = vector.load %arg13[%41, %c0_16] : memref<16x32xf32, #tpu.memory_space<vmem>>, vector<2x32xf32>
    tpu.vector_store %arg13[%41, %c0_16], %40 {strides = array<i32>} : memref<16x32xf32, #tpu.memory_space<vmem>>, vector<2x32xf32>,
    %c1_i32 = arith.constant 1 : i32
    %c2_i32_17 = arith.constant 2 : i32
    %43 = arith.muli %c1_i32, %c2_i32_17 : i32
    %44 = arith.index_cast %43 : i32 to index
    %c0_18 = arith.constant 0 : index
    %45 = vector.load %arg12[%44, %c0_18] : memref<16x128xf32, #tpu.memory_space<vmem>>, vector<2x128xf32>
    %cst_19 = arith.constant dense<0.000000e+00> : vector<2x128xf32>
    %46 = tpu.matmul %40, %4, %cst_19 {dimension_numbers = #tpu.dot_dimension_numbers<[1], [0], [0], [1], [0, 0, 1, 1], [], []>} : vector<2x32xf32>, vector<32x128xf32>, vector<2x128xf32> -> vector<2x128xf32>
    %47 = arith.addf %45, %46 : vector<2x128xf32>
    %48 = arith.addf %47, %7 : vector<2x128xf32>
    %49 = vector.extract_strided_slice %48 {offsets = [0, 0], sizes = [2, 32], strides = [1, 1]} : vector<2x128xf32> to vector<2x32xf32>
    %50 = arith.negf %49 : vector<2x32xf32>
    %51 = math.exp %50 : vector<2x32xf32>
    %cst_20 = arith.constant 1.000000e+00 : f32
    %52 = vector.broadcast %cst_20 : f32 to vector<2x32xf32>
    %53 = arith.addf %52, %51 : vector<2x32xf32>
    %54 = arith.divf %52, %53 : vector<2x32xf32>
    %55 = vector.extract_strided_slice %48 {offsets = [0, 32], sizes = [2, 32], strides = [1, 1]} : vector<2x128xf32> to vector<2x32xf32>
    %56 = arith.negf %55 : vector<2x32xf32>
    %57 = math.exp %56 : vector<2x32xf32>
    %cst_21 = arith.constant 1.000000e+00 : f32
    %58 = vector.broadcast %cst_21 : f32 to vector<2x32xf32>
    %59 = arith.addf %58, %57 : vector<2x32xf32>
    %60 = arith.divf %58, %59 : vector<2x32xf32>
    %61 = vector.extract_strided_slice %48 {offsets = [0, 64], sizes = [2, 32], strides = [1, 1]} : vector<2x128xf32> to vector<2x32xf32>
    %62 = math.tanh %61 : vector<2x32xf32>
    %63 = vector.extract_strided_slice %48 {offsets = [0, 96], sizes = [2, 32], strides = [1, 1]} : vector<2x128xf32> to vector<2x32xf32>
    %64 = arith.negf %63 : vector<2x32xf32>
    %65 = math.exp %64 : vector<2x32xf32>
    %cst_22 = arith.constant 1.000000e+00 : f32
    %66 = vector.broadcast %cst_22 : f32 to vector<2x32xf32>
    %67 = arith.addf %66, %65 : vector<2x32xf32>
    %68 = arith.divf %66, %67 : vector<2x32xf32>
    %69 = arith.mulf %60, %38 : vector<2x32xf32>
    %70 = arith.mulf %54, %62 : vector<2x32xf32>
    %71 = arith.addf %69, %70 : vector<2x32xf32>
    %72 = math.tanh %71 : vector<2x32xf32>
    %73 = arith.mulf %68, %72 : vector<2x32xf32>
    %74 = arith.index_cast %43 : i32 to index
    %c0_23 = arith.constant 0 : index
    %75 = vector.load %arg13[%74, %c0_23] : memref<16x32xf32, #tpu.memory_space<vmem>>, vector<2x32xf32>
    tpu.vector_store %arg13[%74, %c0_23], %73 {strides = array<i32>} : memref<16x32xf32, #tpu.memory_space<vmem>>, vector<2x32xf32>,
    %c2_i32_24 = arith.constant 2 : i32
    %c2_i32_25 = arith.constant 2 : i32
    %76 = arith.muli %c2_i32_24, %c2_i32_25 : i32
    %77 = arith.index_cast %76 : i32 to index
    %c0_26 = arith.constant 0 : index
    %78 = vector.load %arg12[%77, %c0_26] : memref<16x128xf32, #tpu.memory_space<vmem>>, vector<2x128xf32>
    %cst_27 = arith.constant dense<0.000000e+00> : vector<2x128xf32>
    %79 = tpu.matmul %73, %4, %cst_27 {dimension_numbers = #tpu.dot_dimension_numbers<[1], [0], [0], [1], [0, 0, 1, 1], [], []>} : vector<2x32xf32>, vector<32x128xf32>, vector<2x128xf32> -> vector<2x128xf32>
    %80 = arith.addf %78, %79 : vector<2x128xf32>
    %81 = arith.addf %80, %7 : vector<2x128xf32>
    %82 = vector.extract_strided_slice %81 {offsets = [0, 0], sizes = [2, 32], strides = [1, 1]} : vector<2x128xf32> to vector<2x32xf32>
    %83 = arith.negf %82 : vector<2x32xf32>
    %84 = math.exp %83 : vector<2x32xf32>
    %cst_28 = arith.constant 1.000000e+00 : f32
    %85 = vector.broadcast %cst_28 : f32 to vector<2x32xf32>
    %86 = arith.addf %85, %84 : vector<2x32xf32>
    %87 = arith.divf %85, %86 : vector<2x32xf32>
    %88 = vector.extract_strided_slice %81 {offsets = [0, 32], sizes = [2, 32], strides = [1, 1]} : vector<2x128xf32> to vector<2x32xf32>
    %89 = arith.negf %88 : vector<2x32xf32>
    %90 = math.exp %89 : vector<2x32xf32>
    %cst_29 = arith.constant 1.000000e+00 : f32
    %91 = vector.broadcast %cst_29 : f32 to vector<2x32xf32>
    %92 = arith.addf %91, %90 : vector<2x32xf32>
    %93 = arith.divf %91, %92 : vector<2x32xf32>
    %94 = vector.extract_strided_slice %81 {offsets = [0, 64], sizes = [2, 32], strides = [1, 1]} : vector<2x128xf32> to vector<2x32xf32>
    %95 = math.tanh %94 : vector<2x32xf32>
    %96 = vector.extract_strided_slice %81 {offsets = [0, 96], sizes = [2, 32], strides = [1, 1]} : vector<2x128xf32> to vector<2x32xf32>
    %97 = arith.negf %96 : vector<2x32xf32>
    %98 = math.exp %97 : vector<2x32xf32>
    %cst_30 = arith.constant 1.000000e+00 : f32
    %99 = vector.broadcast %cst_30 : f32 to vector<2x32xf32>
    %100 = arith.addf %99, %98 : vector<2x32xf32>
    %101 = arith.divf %99, %100 : vector<2x32xf32>
    %102 = arith.mulf %93, %71 : vector<2x32xf32>
    %103 = arith.mulf %87, %95 : vector<2x32xf32>
    %104 = arith.addf %102, %103 : vector<2x32xf32>
    %105 = math.tanh %104 : vector<2x32xf32>
    %106 = arith.mulf %101, %105 : vector<2x32xf32>
    %107 = arith.index_cast %76 : i32 to index
    %c0_31 = arith.constant 0 : index
    %108 = vector.load %arg13[%107, %c0_31] : memref<16x32xf32, #tpu.memory_space<vmem>>, vector<2x32xf32>
    tpu.vector_store %arg13[%107, %c0_31], %106 {strides = array<i32>} : memref<16x32xf32, #tpu.memory_space<vmem>>, vector<2x32xf32>,
    %c3_i32 = arith.constant 3 : i32
    %c2_i32_32 = arith.constant 2 : i32
    %109 = arith.muli %c3_i32, %c2_i32_32 : i32
    %110 = arith.index_cast %109 : i32 to index
    %c0_33 = arith.constant 0 : index
    %111 = vector.load %arg12[%110, %c0_33] : memref<16x128xf32, #tpu.memory_space<vmem>>, vector<2x128xf32>
    %cst_34 = arith.constant dense<0.000000e+00> : vector<2x128xf32>
    %112 = tpu.matmul %106, %4, %cst_34 {dimension_numbers = #tpu.dot_dimension_numbers<[1], [0], [0], [1], [0, 0, 1, 1], [], []>} : vector<2x32xf32>, vector<32x128xf32>, vector<2x128xf32> -> vector<2x128xf32>
    %113 = arith.addf %111, %112 : vector<2x128xf32>
    %114 = arith.addf %113, %7 : vector<2x128xf32>
    %115 = vector.extract_strided_slice %114 {offsets = [0, 0], sizes = [2, 32], strides = [1, 1]} : vector<2x128xf32> to vector<2x32xf32>
    %116 = arith.negf %115 : vector<2x32xf32>
    %117 = math.exp %116 : vector<2x32xf32>
    %cst_35 = arith.constant 1.000000e+00 : f32
    %118 = vector.broadcast %cst_35 : f32 to vector<2x32xf32>
    %119 = arith.addf %118, %117 : vector<2x32xf32>
    %120 = arith.divf %118, %119 : vector<2x32xf32>
    %121 = vector.extract_strided_slice %114 {offsets = [0, 32], sizes = [2, 32], strides = [1, 1]} : vector<2x128xf32> to vector<2x32xf32>
    %122 = arith.negf %121 : vector<2x32xf32>
    %123 = math.exp %122 : vector<2x32xf32>
    %cst_36 = arith.constant 1.000000e+00 : f32
    %124 = vector.broadcast %cst_36 : f32 to vector<2x32xf32>
    %125 = arith.addf %124, %123 : vector<2x32xf32>
    %126 = arith.divf %124, %125 : vector<2x32xf32>
    %127 = vector.extract_strided_slice %114 {offsets = [0, 64], sizes = [2, 32], strides = [1, 1]} : vector<2x128xf32> to vector<2x32xf32>
    %128 = math.tanh %127 : vector<2x32xf32>
    %129 = vector.extract_strided_slice %114 {offsets = [0, 96], sizes = [2, 32], strides = [1, 1]} : vector<2x128xf32> to vector<2x32xf32>
    %130 = arith.negf %129 : vector<2x32xf32>
    %131 = math.exp %130 : vector<2x32xf32>
    %cst_37 = arith.constant 1.000000e+00 : f32
    %132 = vector.broadcast %cst_37 : f32 to vector<2x32xf32>
    %133 = arith.addf %132, %131 : vector<2x32xf32>
    %134 = arith.divf %132, %133 : vector<2x32xf32>
    %135 = arith.mulf %126, %104 : vector<2x32xf32>
    %136 = arith.mulf %120, %128 : vector<2x32xf32>
    %137 = arith.addf %135, %136 : vector<2x32xf32>
    %138 = math.tanh %137 : vector<2x32xf32>
    %139 = arith.mulf %134, %138 : vector<2x32xf32>
    %140 = arith.index_cast %109 : i32 to index
    %c0_38 = arith.constant 0 : index
    %141 = vector.load %arg13[%140, %c0_38] : memref<16x32xf32, #tpu.memory_space<vmem>>, vector<2x32xf32>
    tpu.vector_store %arg13[%140, %c0_38], %139 {strides = array<i32>} : memref<16x32xf32, #tpu.memory_space<vmem>>, vector<2x32xf32>,
    %c4_i32 = arith.constant 4 : i32
    %c2_i32_39 = arith.constant 2 : i32
    %142 = arith.muli %c4_i32, %c2_i32_39 : i32
    %143 = arith.index_cast %142 : i32 to index
    %c0_40 = arith.constant 0 : index
    %144 = vector.load %arg12[%143, %c0_40] : memref<16x128xf32, #tpu.memory_space<vmem>>, vector<2x128xf32>
    %cst_41 = arith.constant dense<0.000000e+00> : vector<2x128xf32>
    %145 = tpu.matmul %139, %4, %cst_41 {dimension_numbers = #tpu.dot_dimension_numbers<[1], [0], [0], [1], [0, 0, 1, 1], [], []>} : vector<2x32xf32>, vector<32x128xf32>, vector<2x128xf32> -> vector<2x128xf32>
    %146 = arith.addf %144, %145 : vector<2x128xf32>
    %147 = arith.addf %146, %7 : vector<2x128xf32>
    %148 = vector.extract_strided_slice %147 {offsets = [0, 0], sizes = [2, 32], strides = [1, 1]} : vector<2x128xf32> to vector<2x32xf32>
    %149 = arith.negf %148 : vector<2x32xf32>
    %150 = math.exp %149 : vector<2x32xf32>
    %cst_42 = arith.constant 1.000000e+00 : f32
    %151 = vector.broadcast %cst_42 : f32 to vector<2x32xf32>
    %152 = arith.addf %151, %150 : vector<2x32xf32>
    %153 = arith.divf %151, %152 : vector<2x32xf32>
    %154 = vector.extract_strided_slice %147 {offsets = [0, 32], sizes = [2, 32], strides = [1, 1]} : vector<2x128xf32> to vector<2x32xf32>
    %155 = arith.negf %154 : vector<2x32xf32>
    %156 = math.exp %155 : vector<2x32xf32>
    %cst_43 = arith.constant 1.000000e+00 : f32
    %157 = vector.broadcast %cst_43 : f32 to vector<2x32xf32>
    %158 = arith.addf %157, %156 : vector<2x32xf32>
    %159 = arith.divf %157, %158 : vector<2x32xf32>
    %160 = vector.extract_strided_slice %147 {offsets = [0, 64], sizes = [2, 32], strides = [1, 1]} : vector<2x128xf32> to vector<2x32xf32>
    %161 = math.tanh %160 : vector<2x32xf32>
    %162 = vector.extract_strided_slice %147 {offsets = [0, 96], sizes = [2, 32], strides = [1, 1]} : vector<2x128xf32> to vector<2x32xf32>
    %163 = arith.negf %162 : vector<2x32xf32>
    %164 = math.exp %163 : vector<2x32xf32>
    %cst_44 = arith.constant 1.000000e+00 : f32
    %165 = vector.broadcast %cst_44 : f32 to vector<2x32xf32>
    %166 = arith.addf %165, %164 : vector<2x32xf32>
    %167 = arith.divf %165, %166 : vector<2x32xf32>
    %168 = arith.mulf %159, %137 : vector<2x32xf32>
    %169 = arith.mulf %153, %161 : vector<2x32xf32>
    %170 = arith.addf %168, %169 : vector<2x32xf32>
    %171 = math.tanh %170 : vector<2x32xf32>
    %172 = arith.mulf %167, %171 : vector<2x32xf32>
    %173 = arith.index_cast %142 : i32 to index
    %c0_45 = arith.constant 0 : index
    %174 = vector.load %arg13[%173, %c0_45] : memref<16x32xf32, #tpu.memory_space<vmem>>, vector<2x32xf32>
    tpu.vector_store %arg13[%173, %c0_45], %172 {strides = array<i32>} : memref<16x32xf32, #tpu.memory_space<vmem>>, vector<2x32xf32>,
    %c5_i32 = arith.constant 5 : i32
    %c2_i32_46 = arith.constant 2 : i32
    %175 = arith.muli %c5_i32, %c2_i32_46 : i32
    %176 = arith.index_cast %175 : i32 to index
    %c0_47 = arith.constant 0 : index
    %177 = vector.load %arg12[%176, %c0_47] : memref<16x128xf32, #tpu.memory_space<vmem>>, vector<2x128xf32>
    %cst_48 = arith.constant dense<0.000000e+00> : vector<2x128xf32>
    %178 = tpu.matmul %172, %4, %cst_48 {dimension_numbers = #tpu.dot_dimension_numbers<[1], [0], [0], [1], [0, 0, 1, 1], [], []>} : vector<2x32xf32>, vector<32x128xf32>, vector<2x128xf32> -> vector<2x128xf32>
    %179 = arith.addf %177, %178 : vector<2x128xf32>
    %180 = arith.addf %179, %7 : vector<2x128xf32>
    %181 = vector.extract_strided_slice %180 {offsets = [0, 0], sizes = [2, 32], strides = [1, 1]} : vector<2x128xf32> to vector<2x32xf32>
    %182 = arith.negf %181 : vector<2x32xf32>
    %183 = math.exp %182 : vector<2x32xf32>
    %cst_49 = arith.constant 1.000000e+00 : f32
    %184 = vector.broadcast %cst_49 : f32 to vector<2x32xf32>
    %185 = arith.addf %184, %183 : vector<2x32xf32>
    %186 = arith.divf %184, %185 : vector<2x32xf32>
    %187 = vector.extract_strided_slice %180 {offsets = [0, 32], sizes = [2, 32], strides = [1, 1]} : vector<2x128xf32> to vector<2x32xf32>
    %188 = arith.negf %187 : vector<2x32xf32>
    %189 = math.exp %188 : vector<2x32xf32>
    %cst_50 = arith.constant 1.000000e+00 : f32
    %190 = vector.broadcast %cst_50 : f32 to vector<2x32xf32>
    %191 = arith.addf %190, %189 : vector<2x32xf32>
    %192 = arith.divf %190, %191 : vector<2x32xf32>
    %193 = vector.extract_strided_slice %180 {offsets = [0, 64], sizes = [2, 32], strides = [1, 1]} : vector<2x128xf32> to vector<2x32xf32>
    %194 = math.tanh %193 : vector<2x32xf32>
    %195 = vector.extract_strided_slice %180 {offsets = [0, 96], sizes = [2, 32], strides = [1, 1]} : vector<2x128xf32> to vector<2x32xf32>
    %196 = arith.negf %195 : vector<2x32xf32>
    %197 = math.exp %196 : vector<2x32xf32>
    %cst_51 = arith.constant 1.000000e+00 : f32
    %198 = vector.broadcast %cst_51 : f32 to vector<2x32xf32>
    %199 = arith.addf %198, %197 : vector<2x32xf32>
    %200 = arith.divf %198, %199 : vector<2x32xf32>
    %201 = arith.mulf %192, %170 : vector<2x32xf32>
    %202 = arith.mulf %186, %194 : vector<2x32xf32>
    %203 = arith.addf %201, %202 : vector<2x32xf32>
    %204 = math.tanh %203 : vector<2x32xf32>
    %205 = arith.mulf %200, %204 : vector<2x32xf32>
    %206 = arith.index_cast %175 : i32 to index
    %c0_52 = arith.constant 0 : index
    %207 = vector.load %arg13[%206, %c0_52] : memref<16x32xf32, #tpu.memory_space<vmem>>, vector<2x32xf32>
    tpu.vector_store %arg13[%206, %c0_52], %205 {strides = array<i32>} : memref<16x32xf32, #tpu.memory_space<vmem>>, vector<2x32xf32>,
    %c6_i32 = arith.constant 6 : i32
    %c2_i32_53 = arith.constant 2 : i32
    %208 = arith.muli %c6_i32, %c2_i32_53 : i32
    %209 = arith.index_cast %208 : i32 to index
    %c0_54 = arith.constant 0 : index
    %210 = vector.load %arg12[%209, %c0_54] : memref<16x128xf32, #tpu.memory_space<vmem>>, vector<2x128xf32>
    %cst_55 = arith.constant dense<0.000000e+00> : vector<2x128xf32>
    %211 = tpu.matmul %205, %4, %cst_55 {dimension_numbers = #tpu.dot_dimension_numbers<[1], [0], [0], [1], [0, 0, 1, 1], [], []>} : vector<2x32xf32>, vector<32x128xf32>, vector<2x128xf32> -> vector<2x128xf32>
    %212 = arith.addf %210, %211 : vector<2x128xf32>
    %213 = arith.addf %212, %7 : vector<2x128xf32>
    %214 = vector.extract_strided_slice %213 {offsets = [0, 0], sizes = [2, 32], strides = [1, 1]} : vector<2x128xf32> to vector<2x32xf32>
    %215 = arith.negf %214 : vector<2x32xf32>
    %216 = math.exp %215 : vector<2x32xf32>
    %cst_56 = arith.constant 1.000000e+00 : f32
    %217 = vector.broadcast %cst_56 : f32 to vector<2x32xf32>
    %218 = arith.addf %217, %216 : vector<2x32xf32>
    %219 = arith.divf %217, %218 : vector<2x32xf32>
    %220 = vector.extract_strided_slice %213 {offsets = [0, 32], sizes = [2, 32], strides = [1, 1]} : vector<2x128xf32> to vector<2x32xf32>
    %221 = arith.negf %220 : vector<2x32xf32>
    %222 = math.exp %221 : vector<2x32xf32>
    %cst_57 = arith.constant 1.000000e+00 : f32
    %223 = vector.broadcast %cst_57 : f32 to vector<2x32xf32>
    %224 = arith.addf %223, %222 : vector<2x32xf32>
    %225 = arith.divf %223, %224 : vector<2x32xf32>
    %226 = vector.extract_strided_slice %213 {offsets = [0, 64], sizes = [2, 32], strides = [1, 1]} : vector<2x128xf32> to vector<2x32xf32>
    %227 = math.tanh %226 : vector<2x32xf32>
    %228 = vector.extract_strided_slice %213 {offsets = [0, 96], sizes = [2, 32], strides = [1, 1]} : vector<2x128xf32> to vector<2x32xf32>
    %229 = arith.negf %228 : vector<2x32xf32>
    %230 = math.exp %229 : vector<2x32xf32>
    %cst_58 = arith.constant 1.000000e+00 : f32
    %231 = vector.broadcast %cst_58 : f32 to vector<2x32xf32>
    %232 = arith.addf %231, %230 : vector<2x32xf32>
    %233 = arith.divf %231, %232 : vector<2x32xf32>
    %234 = arith.mulf %225, %203 : vector<2x32xf32>
    %235 = arith.mulf %219, %227 : vector<2x32xf32>
    %236 = arith.addf %234, %235 : vector<2x32xf32>
    %237 = math.tanh %236 : vector<2x32xf32>
    %238 = arith.mulf %233, %237 : vector<2x32xf32>
    %239 = arith.index_cast %208 : i32 to index
    %c0_59 = arith.constant 0 : index
    %240 = vector.load %arg13[%239, %c0_59] : memref<16x32xf32, #tpu.memory_space<vmem>>, vector<2x32xf32>
    tpu.vector_store %arg13[%239, %c0_59], %238 {strides = array<i32>} : memref<16x32xf32, #tpu.memory_space<vmem>>, vector<2x32xf32>,
    %c7_i32 = arith.constant 7 : i32
    %c2_i32_60 = arith.constant 2 : i32
    %241 = arith.muli %c7_i32, %c2_i32_60 : i32
    %242 = arith.index_cast %241 : i32 to index
    %c0_61 = arith.constant 0 : index
    %243 = vector.load %arg12[%242, %c0_61] : memref<16x128xf32, #tpu.memory_space<vmem>>, vector<2x128xf32>
    %cst_62 = arith.constant dense<0.000000e+00> : vector<2x128xf32>
    %244 = tpu.matmul %238, %4, %cst_62 {dimension_numbers = #tpu.dot_dimension_numbers<[1], [0], [0], [1], [0, 0, 1, 1], [], []>} : vector<2x32xf32>, vector<32x128xf32>, vector<2x128xf32> -> vector<2x128xf32>
    %245 = arith.addf %243, %244 : vector<2x128xf32>
    %246 = arith.addf %245, %7 : vector<2x128xf32>
    %247 = vector.extract_strided_slice %246 {offsets = [0, 0], sizes = [2, 32], strides = [1, 1]} : vector<2x128xf32> to vector<2x32xf32>
    %248 = arith.negf %247 : vector<2x32xf32>
    %249 = math.exp %248 : vector<2x32xf32>
    %cst_63 = arith.constant 1.000000e+00 : f32
    %250 = vector.broadcast %cst_63 : f32 to vector<2x32xf32>
    %251 = arith.addf %250, %249 : vector<2x32xf32>
    %252 = arith.divf %250, %251 : vector<2x32xf32>
    %253 = vector.extract_strided_slice %246 {offsets = [0, 32], sizes = [2, 32], strides = [1, 1]} : vector<2x128xf32> to vector<2x32xf32>
    %254 = arith.negf %253 : vector<2x32xf32>
    %255 = math.exp %254 : vector<2x32xf32>
    %cst_64 = arith.constant 1.000000e+00 : f32
    %256 = vector.broadcast %cst_64 : f32 to vector<2x32xf32>
    %257 = arith.addf %256, %255 : vector<2x32xf32>
    %258 = arith.divf %256, %257 : vector<2x32xf32>
    %259 = vector.extract_strided_slice %246 {offsets = [0, 64], sizes = [2, 32], strides = [1, 1]} : vector<2x128xf32> to vector<2x32xf32>
    %260 = math.tanh %259 : vector<2x32xf32>
    %261 = vector.extract_strided_slice %246 {offsets = [0, 96], sizes = [2, 32], strides = [1, 1]} : vector<2x128xf32> to vector<2x32xf32>
    %262 = arith.negf %261 : vector<2x32xf32>
    %263 = math.exp %262 : vector<2x32xf32>
    %cst_65 = arith.constant 1.000000e+00 : f32
    %264 = vector.broadcast %cst_65 : f32 to vector<2x32xf32>
    %265 = arith.addf %264, %263 : vector<2x32xf32>
    %266 = arith.divf %264, %265 : vector<2x32xf32>
    %267 = arith.mulf %258, %236 : vector<2x32xf32>
    %268 = arith.mulf %252, %260 : vector<2x32xf32>
    %269 = arith.addf %267, %268 : vector<2x32xf32>
    %270 = math.tanh %269 : vector<2x32xf32>
    %271 = arith.mulf %266, %270 : vector<2x32xf32>
    %272 = arith.index_cast %241 : i32 to index
    %c0_66 = arith.constant 0 : index
    %273 = vector.load %arg13[%272, %c0_66] : memref<16x32xf32, #tpu.memory_space<vmem>>, vector<2x32xf32>
    tpu.vector_store %arg13[%272, %c0_66], %271 {strides = array<i32>} : memref<16x32xf32, #tpu.memory_space<vmem>>, vector<2x32xf32>,
    %c8_i32 = arith.constant 8 : i32
    %c0_67 = arith.constant 0 : index
    %c0_68 = arith.constant 0 : index
    %c0_69 = arith.constant 0 : index
    %274 = vector.load %arg10[%c0_67, %c0_68, %c0_69] : memref<2x2x32xf32, #tpu.memory_space<vmem>>, vector<1x2x32xf32>
    %275 = vector.shape_cast %274 : vector<1x2x32xf32> to vector<2x32xf32>
    %276 = vector.shape_cast %271 : vector<2x32xf32> to vector<1x2x32xf32>
    tpu.vector_store %arg10[%c0_67, %c0_68, %c0_69], %276 {strides = array<i32>} : memref<2x2x32xf32, #tpu.memory_space<vmem>>, vector<1x2x32xf32>,
    %c0_70 = arith.constant 0 : index
    %c0_71 = arith.constant 0 : index
    %c0_72 = arith.constant 0 : index
    %277 = vector.load %arg11[%c0_70, %c0_71, %c0_72] : memref<2x2x32xf32, #tpu.memory_space<vmem>>, vector<1x2x32xf32>
    %278 = vector.shape_cast %277 : vector<1x2x32xf32> to vector<2x32xf32>
    %279 = vector.shape_cast %269 : vector<2x32xf32> to vector<1x2x32xf32>
    tpu.vector_store %arg11[%c0_70, %c0_71, %c0_72], %279 {strides = array<i32>} : memref<2x2x32xf32, #tpu.memory_space<vmem>>, vector<1x2x32xf32>,
    %c0_73 = arith.constant 0 : index
    %c0_74 = arith.constant 0 : index
    %280 = vector.load %arg13[%c0_73, %c0_74] : memref<16x32xf32, #tpu.memory_space<vmem>>, vector<16x32xf32>
    %c0_75 = arith.constant 0 : index
    %c0_76 = arith.constant 0 : index
    %281 = vector.load %arg4[%c0_75, %c0_76] : memref<32x128xf32, #tpu.memory_space<vmem>>, vector<32x128xf32>
    %cst_77 = arith.constant dense<0.000000e+00> : vector<16x128xf32>
    %282 = tpu.matmul %280, %281, %cst_77 {dimension_numbers = #tpu.dot_dimension_numbers<[1], [0], [0], [1], [0, 0, 1, 1], [], []>} : vector<16x32xf32>, vector<32x128xf32>, vector<16x128xf32> -> vector<16x128xf32>
    %c0_78 = arith.constant 0 : index
    %c0_79 = arith.constant 0 : index
    %283 = vector.load %arg12[%c0_78, %c0_79] : memref<16x128xf32, #tpu.memory_space<vmem>>, vector<16x128xf32>
    tpu.vector_store %arg12[%c0_78, %c0_79], %282 {strides = array<i32>} : memref<16x128xf32, #tpu.memory_space<vmem>>, vector<16x128xf32>,
    %c0_80 = arith.constant 0 : index
    %c0_81 = arith.constant 0 : index
    %284 = vector.load %arg5[%c0_80, %c0_81] : memref<32x128xf32, #tpu.memory_space<vmem>>, vector<32x128xf32>
    %c0_82 = arith.constant 0 : index
    %c0_83 = arith.constant 0 : index
    %285 = vector.load %arg6[%c0_82, %c0_83] : memref<1x128xf32, #tpu.memory_space<vmem>>, vector<1x128xf32>
    %286 = vector.shape_cast %285 : vector<1x128xf32> to vector<1x128xf32>
    %287 = vector.broadcast %286 : vector<1x128xf32> to vector<2x128xf32>
    %cst_84 = arith.constant 0.000000e+00 : f32
    %288 = vector.broadcast %cst_84 : f32 to vector<2x32xf32>
    %cst_85 = arith.constant 0.000000e+00 : f32
    %289 = vector.broadcast %cst_85 : f32 to vector<2x32xf32>
    %c0_i32_86 = arith.constant 0 : i32
    %c2_i32_87 = arith.constant 2 : i32
    %290 = arith.muli %c0_i32_86, %c2_i32_87 : i32
    %291 = arith.index_cast %290 : i32 to index
    %c0_88 = arith.constant 0 : index
    %292 = vector.load %arg12[%291, %c0_88] : memref<16x128xf32, #tpu.memory_space<vmem>>, vector<2x128xf32>
    %cst_89 = arith.constant dense<0.000000e+00> : vector<2x128xf32>
    %293 = tpu.matmul %288, %284, %cst_89 {dimension_numbers = #tpu.dot_dimension_numbers<[1], [0], [0], [1], [0, 0, 1, 1], [], []>} : vector<2x32xf32>, vector<32x128xf32>, vector<2x128xf32> -> vector<2x128xf32>
    %294 = arith.addf %292, %293 : vector<2x128xf32>
    %295 = arith.addf %294, %287 : vector<2x128xf32>
    %296 = vector.extract_strided_slice %295 {offsets = [0, 0], sizes = [2, 32], strides = [1, 1]} : vector<2x128xf32> to vector<2x32xf32>
    %297 = arith.negf %296 : vector<2x32xf32>
    %298 = math.exp %297 : vector<2x32xf32>
    %cst_90 = arith.constant 1.000000e+00 : f32
    %299 = vector.broadcast %cst_90 : f32 to vector<2x32xf32>
    %300 = arith.addf %299, %298 : vector<2x32xf32>
    %301 = arith.divf %299, %300 : vector<2x32xf32>
    %302 = vector.extract_strided_slice %295 {offsets = [0, 32], sizes = [2, 32], strides = [1, 1]} : vector<2x128xf32> to vector<2x32xf32>
    %303 = arith.negf %302 : vector<2x32xf32>
    %304 = math.exp %303 : vector<2x32xf32>
    %cst_91 = arith.constant 1.000000e+00 : f32
    %305 = vector.broadcast %cst_91 : f32 to vector<2x32xf32>
    %306 = arith.addf %305, %304 : vector<2x32xf32>
    %307 = arith.divf %305, %306 : vector<2x32xf32>
    %308 = vector.extract_strided_slice %295 {offsets = [0, 64], sizes = [2, 32], strides = [1, 1]} : vector<2x128xf32> to vector<2x32xf32>
    %309 = math.tanh %308 : vector<2x32xf32>
    %310 = vector.extract_strided_slice %295 {offsets = [0, 96], sizes = [2, 32], strides = [1, 1]} : vector<2x128xf32> to vector<2x32xf32>
    %311 = arith.negf %310 : vector<2x32xf32>
    %312 = math.exp %311 : vector<2x32xf32>
    %cst_92 = arith.constant 1.000000e+00 : f32
    %313 = vector.broadcast %cst_92 : f32 to vector<2x32xf32>
    %314 = arith.addf %313, %312 : vector<2x32xf32>
    %315 = arith.divf %313, %314 : vector<2x32xf32>
    %316 = arith.mulf %307, %289 : vector<2x32xf32>
    %317 = arith.mulf %301, %309 : vector<2x32xf32>
    %318 = arith.addf %316, %317 : vector<2x32xf32>
    %319 = math.tanh %318 : vector<2x32xf32>
    %320 = arith.mulf %315, %319 : vector<2x32xf32>
    %321 = arith.index_cast %290 : i32 to index
    %c0_93 = arith.constant 0 : index
    %322 = vector.load %arg13[%321, %c0_93] : memref<16x32xf32, #tpu.memory_space<vmem>>, vector<2x32xf32>
    tpu.vector_store %arg13[%321, %c0_93], %320 {strides = array<i32>} : memref<16x32xf32, #tpu.memory_space<vmem>>, vector<2x32xf32>,
    %c1_i32_94 = arith.constant 1 : i32
    %c2_i32_95 = arith.constant 2 : i32
    %323 = arith.muli %c1_i32_94, %c2_i32_95 : i32
    %324 = arith.index_cast %323 : i32 to index
    %c0_96 = arith.constant 0 : index
    %325 = vector.load %arg12[%324, %c0_96] : memref<16x128xf32, #tpu.memory_space<vmem>>, vector<2x128xf32>
    %cst_97 = arith.constant dense<0.000000e+00> : vector<2x128xf32>
    %326 = tpu.matmul %320, %284, %cst_97 {dimension_numbers = #tpu.dot_dimension_numbers<[1], [0], [0], [1], [0, 0, 1, 1], [], []>} : vector<2x32xf32>, vector<32x128xf32>, vector<2x128xf32> -> vector<2x128xf32>
    %327 = arith.addf %325, %326 : vector<2x128xf32>
    %328 = arith.addf %327, %287 : vector<2x128xf32>
    %329 = vector.extract_strided_slice %328 {offsets = [0, 0], sizes = [2, 32], strides = [1, 1]} : vector<2x128xf32> to vector<2x32xf32>
    %330 = arith.negf %329 : vector<2x32xf32>
    %331 = math.exp %330 : vector<2x32xf32>
    %cst_98 = arith.constant 1.000000e+00 : f32
    %332 = vector.broadcast %cst_98 : f32 to vector<2x32xf32>
    %333 = arith.addf %332, %331 : vector<2x32xf32>
    %334 = arith.divf %332, %333 : vector<2x32xf32>
    %335 = vector.extract_strided_slice %328 {offsets = [0, 32], sizes = [2, 32], strides = [1, 1]} : vector<2x128xf32> to vector<2x32xf32>
    %336 = arith.negf %335 : vector<2x32xf32>
    %337 = math.exp %336 : vector<2x32xf32>
    %cst_99 = arith.constant 1.000000e+00 : f32
    %338 = vector.broadcast %cst_99 : f32 to vector<2x32xf32>
    %339 = arith.addf %338, %337 : vector<2x32xf32>
    %340 = arith.divf %338, %339 : vector<2x32xf32>
    %341 = vector.extract_strided_slice %328 {offsets = [0, 64], sizes = [2, 32], strides = [1, 1]} : vector<2x128xf32> to vector<2x32xf32>
    %342 = math.tanh %341 : vector<2x32xf32>
    %343 = vector.extract_strided_slice %328 {offsets = [0, 96], sizes = [2, 32], strides = [1, 1]} : vector<2x128xf32> to vector<2x32xf32>
    %344 = arith.negf %343 : vector<2x32xf32>
    %345 = math.exp %344 : vector<2x32xf32>
    %cst_100 = arith.constant 1.000000e+00 : f32
    %346 = vector.broadcast %cst_100 : f32 to vector<2x32xf32>
    %347 = arith.addf %346, %345 : vector<2x32xf32>
    %348 = arith.divf %346, %347 : vector<2x32xf32>
    %349 = arith.mulf %340, %318 : vector<2x32xf32>
    %350 = arith.mulf %334, %342 : vector<2x32xf32>
    %351 = arith.addf %349, %350 : vector<2x32xf32>
    %352 = math.tanh %351 : vector<2x32xf32>
    %353 = arith.mulf %348, %352 : vector<2x32xf32>
    %354 = arith.index_cast %323 : i32 to index
    %c0_101 = arith.constant 0 : index
    %355 = vector.load %arg13[%354, %c0_101] : memref<16x32xf32, #tpu.memory_space<vmem>>, vector<2x32xf32>
    tpu.vector_store %arg13[%354, %c0_101], %353 {strides = array<i32>} : memref<16x32xf32, #tpu.memory_space<vmem>>, vector<2x32xf32>,
    %c2_i32_102 = arith.constant 2 : i32
    %c2_i32_103 = arith.constant 2 : i32
    %356 = arith.muli %c2_i32_102, %c2_i32_103 : i32
    %357 = arith.index_cast %356 : i32 to index
    %c0_104 = arith.constant 0 : index
    %358 = vector.load %arg12[%357, %c0_104] : memref<16x128xf32, #tpu.memory_space<vmem>>, vector<2x128xf32>
    %cst_105 = arith.constant dense<0.000000e+00> : vector<2x128xf32>
    %359 = tpu.matmul %353, %284, %cst_105 {dimension_numbers = #tpu.dot_dimension_numbers<[1], [0], [0], [1], [0, 0, 1, 1], [], []>} : vector<2x32xf32>, vector<32x128xf32>, vector<2x128xf32> -> vector<2x128xf32>
    %360 = arith.addf %358, %359 : vector<2x128xf32>
    %361 = arith.addf %360, %287 : vector<2x128xf32>
    %362 = vector.extract_strided_slice %361 {offsets = [0, 0], sizes = [2, 32], strides = [1, 1]} : vector<2x128xf32> to vector<2x32xf32>
    %363 = arith.negf %362 : vector<2x32xf32>
    %364 = math.exp %363 : vector<2x32xf32>
    %cst_106 = arith.constant 1.000000e+00 : f32
    %365 = vector.broadcast %cst_106 : f32 to vector<2x32xf32>
    %366 = arith.addf %365, %364 : vector<2x32xf32>
    %367 = arith.divf %365, %366 : vector<2x32xf32>
    %368 = vector.extract_strided_slice %361 {offsets = [0, 32], sizes = [2, 32], strides = [1, 1]} : vector<2x128xf32> to vector<2x32xf32>
    %369 = arith.negf %368 : vector<2x32xf32>
    %370 = math.exp %369 : vector<2x32xf32>
    %cst_107 = arith.constant 1.000000e+00 : f32
    %371 = vector.broadcast %cst_107 : f32 to vector<2x32xf32>
    %372 = arith.addf %371, %370 : vector<2x32xf32>
    %373 = arith.divf %371, %372 : vector<2x32xf32>
    %374 = vector.extract_strided_slice %361 {offsets = [0, 64], sizes = [2, 32], strides = [1, 1]} : vector<2x128xf32> to vector<2x32xf32>
    %375 = math.tanh %374 : vector<2x32xf32>
    %376 = vector.extract_strided_slice %361 {offsets = [0, 96], sizes = [2, 32], strides = [1, 1]} : vector<2x128xf32> to vector<2x32xf32>
    %377 = arith.negf %376 : vector<2x32xf32>
    %378 = math.exp %377 : vector<2x32xf32>
    %cst_108 = arith.constant 1.000000e+00 : f32
    %379 = vector.broadcast %cst_108 : f32 to vector<2x32xf32>
    %380 = arith.addf %379, %378 : vector<2x32xf32>
    %381 = arith.divf %379, %380 : vector<2x32xf32>
    %382 = arith.mulf %373, %351 : vector<2x32xf32>
    %383 = arith.mulf %367, %375 : vector<2x32xf32>
    %384 = arith.addf %382, %383 : vector<2x32xf32>
    %385 = math.tanh %384 : vector<2x32xf32>
    %386 = arith.mulf %381, %385 : vector<2x32xf32>
    %387 = arith.index_cast %356 : i32 to index
    %c0_109 = arith.constant 0 : index
    %388 = vector.load %arg13[%387, %c0_109] : memref<16x32xf32, #tpu.memory_space<vmem>>, vector<2x32xf32>
    tpu.vector_store %arg13[%387, %c0_109], %386 {strides = array<i32>} : memref<16x32xf32, #tpu.memory_space<vmem>>, vector<2x32xf32>,
    %c3_i32_110 = arith.constant 3 : i32
    %c2_i32_111 = arith.constant 2 : i32
    %389 = arith.muli %c3_i32_110, %c2_i32_111 : i32
    %390 = arith.index_cast %389 : i32 to index
    %c0_112 = arith.constant 0 : index
    %391 = vector.load %arg12[%390, %c0_112] : memref<16x128xf32, #tpu.memory_space<vmem>>, vector<2x128xf32>
    %cst_113 = arith.constant dense<0.000000e+00> : vector<2x128xf32>
    %392 = tpu.matmul %386, %284, %cst_113 {dimension_numbers = #tpu.dot_dimension_numbers<[1], [0], [0], [1], [0, 0, 1, 1], [], []>} : vector<2x32xf32>, vector<32x128xf32>, vector<2x128xf32> -> vector<2x128xf32>
    %393 = arith.addf %391, %392 : vector<2x128xf32>
    %394 = arith.addf %393, %287 : vector<2x128xf32>
    %395 = vector.extract_strided_slice %394 {offsets = [0, 0], sizes = [2, 32], strides = [1, 1]} : vector<2x128xf32> to vector<2x32xf32>
    %396 = arith.negf %395 : vector<2x32xf32>
    %397 = math.exp %396 : vector<2x32xf32>
    %cst_114 = arith.constant 1.000000e+00 : f32
    %398 = vector.broadcast %cst_114 : f32 to vector<2x32xf32>
    %399 = arith.addf %398, %397 : vector<2x32xf32>
    %400 = arith.divf %398, %399 : vector<2x32xf32>
    %401 = vector.extract_strided_slice %394 {offsets = [0, 32], sizes = [2, 32], strides = [1, 1]} : vector<2x128xf32> to vector<2x32xf32>
    %402 = arith.negf %401 : vector<2x32xf32>
    %403 = math.exp %402 : vector<2x32xf32>
    %cst_115 = arith.constant 1.000000e+00 : f32
    %404 = vector.broadcast %cst_115 : f32 to vector<2x32xf32>
    %405 = arith.addf %404, %403 : vector<2x32xf32>
    %406 = arith.divf %404, %405 : vector<2x32xf32>
    %407 = vector.extract_strided_slice %394 {offsets = [0, 64], sizes = [2, 32], strides = [1, 1]} : vector<2x128xf32> to vector<2x32xf32>
    %408 = math.tanh %407 : vector<2x32xf32>
    %409 = vector.extract_strided_slice %394 {offsets = [0, 96], sizes = [2, 32], strides = [1, 1]} : vector<2x128xf32> to vector<2x32xf32>
    %410 = arith.negf %409 : vector<2x32xf32>
    %411 = math.exp %410 : vector<2x32xf32>
    %cst_116 = arith.constant 1.000000e+00 : f32
    %412 = vector.broadcast %cst_116 : f32 to vector<2x32xf32>
    %413 = arith.addf %412, %411 : vector<2x32xf32>
    %414 = arith.divf %412, %413 : vector<2x32xf32>
    %415 = arith.mulf %406, %384 : vector<2x32xf32>
    %416 = arith.mulf %400, %408 : vector<2x32xf32>
    %417 = arith.addf %415, %416 : vector<2x32xf32>
    %418 = math.tanh %417 : vector<2x32xf32>
    %419 = arith.mulf %414, %418 : vector<2x32xf32>
    %420 = arith.index_cast %389 : i32 to index
    %c0_117 = arith.constant 0 : index
    %421 = vector.load %arg13[%420, %c0_117] : memref<16x32xf32, #tpu.memory_space<vmem>>, vector<2x32xf32>
    tpu.vector_store %arg13[%420, %c0_117], %419 {strides = array<i32>} : memref<16x32xf32, #tpu.memory_space<vmem>>, vector<2x32xf32>,
    %c4_i32_118 = arith.constant 4 : i32
    %c2_i32_119 = arith.constant 2 : i32
    %422 = arith.muli %c4_i32_118, %c2_i32_119 : i32
    %423 = arith.index_cast %422 : i32 to index
    %c0_120 = arith.constant 0 : index
    %424 = vector.load %arg12[%423, %c0_120] : memref<16x128xf32, #tpu.memory_space<vmem>>, vector<2x128xf32>
    %cst_121 = arith.constant dense<0.000000e+00> : vector<2x128xf32>
    %425 = tpu.matmul %419, %284, %cst_121 {dimension_numbers = #tpu.dot_dimension_numbers<[1], [0], [0], [1], [0, 0, 1, 1], [], []>} : vector<2x32xf32>, vector<32x128xf32>, vector<2x128xf32> -> vector<2x128xf32>
    %426 = arith.addf %424, %425 : vector<2x128xf32>
    %427 = arith.addf %426, %287 : vector<2x128xf32>
    %428 = vector.extract_strided_slice %427 {offsets = [0, 0], sizes = [2, 32], strides = [1, 1]} : vector<2x128xf32> to vector<2x32xf32>
    %429 = arith.negf %428 : vector<2x32xf32>
    %430 = math.exp %429 : vector<2x32xf32>
    %cst_122 = arith.constant 1.000000e+00 : f32
    %431 = vector.broadcast %cst_122 : f32 to vector<2x32xf32>
    %432 = arith.addf %431, %430 : vector<2x32xf32>
    %433 = arith.divf %431, %432 : vector<2x32xf32>
    %434 = vector.extract_strided_slice %427 {offsets = [0, 32], sizes = [2, 32], strides = [1, 1]} : vector<2x128xf32> to vector<2x32xf32>
    %435 = arith.negf %434 : vector<2x32xf32>
    %436 = math.exp %435 : vector<2x32xf32>
    %cst_123 = arith.constant 1.000000e+00 : f32
    %437 = vector.broadcast %cst_123 : f32 to vector<2x32xf32>
    %438 = arith.addf %437, %436 : vector<2x32xf32>
    %439 = arith.divf %437, %438 : vector<2x32xf32>
    %440 = vector.extract_strided_slice %427 {offsets = [0, 64], sizes = [2, 32], strides = [1, 1]} : vector<2x128xf32> to vector<2x32xf32>
    %441 = math.tanh %440 : vector<2x32xf32>
    %442 = vector.extract_strided_slice %427 {offsets = [0, 96], sizes = [2, 32], strides = [1, 1]} : vector<2x128xf32> to vector<2x32xf32>
    %443 = arith.negf %442 : vector<2x32xf32>
    %444 = math.exp %443 : vector<2x32xf32>
    %cst_124 = arith.constant 1.000000e+00 : f32
    %445 = vector.broadcast %cst_124 : f32 to vector<2x32xf32>
    %446 = arith.addf %445, %444 : vector<2x32xf32>
    %447 = arith.divf %445, %446 : vector<2x32xf32>
    %448 = arith.mulf %439, %417 : vector<2x32xf32>
    %449 = arith.mulf %433, %441 : vector<2x32xf32>
    %450 = arith.addf %448, %449 : vector<2x32xf32>
    %451 = math.tanh %450 : vector<2x32xf32>
    %452 = arith.mulf %447, %451 : vector<2x32xf32>
    %453 = arith.index_cast %422 : i32 to index
    %c0_125 = arith.constant 0 : index
    %454 = vector.load %arg13[%453, %c0_125] : memref<16x32xf32, #tpu.memory_space<vmem>>, vector<2x32xf32>
    tpu.vector_store %arg13[%453, %c0_125], %452 {strides = array<i32>} : memref<16x32xf32, #tpu.memory_space<vmem>>, vector<2x32xf32>,
    %c5_i32_126 = arith.constant 5 : i32
    %c2_i32_127 = arith.constant 2 : i32
    %455 = arith.muli %c5_i32_126, %c2_i32_127 : i32
    %456 = arith.index_cast %455 : i32 to index
    %c0_128 = arith.constant 0 : index
    %457 = vector.load %arg12[%456, %c0_128] : memref<16x128xf32, #tpu.memory_space<vmem>>, vector<2x128xf32>
    %cst_129 = arith.constant dense<0.000000e+00> : vector<2x128xf32>
    %458 = tpu.matmul %452, %284, %cst_129 {dimension_numbers = #tpu.dot_dimension_numbers<[1], [0], [0], [1], [0, 0, 1, 1], [], []>} : vector<2x32xf32>, vector<32x128xf32>, vector<2x128xf32> -> vector<2x128xf32>
    %459 = arith.addf %457, %458 : vector<2x128xf32>
    %460 = arith.addf %459, %287 : vector<2x128xf32>
    %461 = vector.extract_strided_slice %460 {offsets = [0, 0], sizes = [2, 32], strides = [1, 1]} : vector<2x128xf32> to vector<2x32xf32>
    %462 = arith.negf %461 : vector<2x32xf32>
    %463 = math.exp %462 : vector<2x32xf32>
    %cst_130 = arith.constant 1.000000e+00 : f32
    %464 = vector.broadcast %cst_130 : f32 to vector<2x32xf32>
    %465 = arith.addf %464, %463 : vector<2x32xf32>
    %466 = arith.divf %464, %465 : vector<2x32xf32>
    %467 = vector.extract_strided_slice %460 {offsets = [0, 32], sizes = [2, 32], strides = [1, 1]} : vector<2x128xf32> to vector<2x32xf32>
    %468 = arith.negf %467 : vector<2x32xf32>
    %469 = math.exp %468 : vector<2x32xf32>
    %cst_131 = arith.constant 1.000000e+00 : f32
    %470 = vector.broadcast %cst_131 : f32 to vector<2x32xf32>
    %471 = arith.addf %470, %469 : vector<2x32xf32>
    %472 = arith.divf %470, %471 : vector<2x32xf32>
    %473 = vector.extract_strided_slice %460 {offsets = [0, 64], sizes = [2, 32], strides = [1, 1]} : vector<2x128xf32> to vector<2x32xf32>
    %474 = math.tanh %473 : vector<2x32xf32>
    %475 = vector.extract_strided_slice %460 {offsets = [0, 96], sizes = [2, 32], strides = [1, 1]} : vector<2x128xf32> to vector<2x32xf32>
    %476 = arith.negf %475 : vector<2x32xf32>
    %477 = math.exp %476 : vector<2x32xf32>
    %cst_132 = arith.constant 1.000000e+00 : f32
    %478 = vector.broadcast %cst_132 : f32 to vector<2x32xf32>
    %479 = arith.addf %478, %477 : vector<2x32xf32>
    %480 = arith.divf %478, %479 : vector<2x32xf32>
    %481 = arith.mulf %472, %450 : vector<2x32xf32>
    %482 = arith.mulf %466, %474 : vector<2x32xf32>
    %483 = arith.addf %481, %482 : vector<2x32xf32>
    %484 = math.tanh %483 : vector<2x32xf32>
    %485 = arith.mulf %480, %484 : vector<2x32xf32>
    %486 = arith.index_cast %455 : i32 to index
    %c0_133 = arith.constant 0 : index
    %487 = vector.load %arg13[%486, %c0_133] : memref<16x32xf32, #tpu.memory_space<vmem>>, vector<2x32xf32>
    tpu.vector_store %arg13[%486, %c0_133], %485 {strides = array<i32>} : memref<16x32xf32, #tpu.memory_space<vmem>>, vector<2x32xf32>,
    %c6_i32_134 = arith.constant 6 : i32
    %c2_i32_135 = arith.constant 2 : i32
    %488 = arith.muli %c6_i32_134, %c2_i32_135 : i32
    %489 = arith.index_cast %488 : i32 to index
    %c0_136 = arith.constant 0 : index
    %490 = vector.load %arg12[%489, %c0_136] : memref<16x128xf32, #tpu.memory_space<vmem>>, vector<2x128xf32>
    %cst_137 = arith.constant dense<0.000000e+00> : vector<2x128xf32>
    %491 = tpu.matmul %485, %284, %cst_137 {dimension_numbers = #tpu.dot_dimension_numbers<[1], [0], [0], [1], [0, 0, 1, 1], [], []>} : vector<2x32xf32>, vector<32x128xf32>, vector<2x128xf32> -> vector<2x128xf32>
    %492 = arith.addf %490, %491 : vector<2x128xf32>
    %493 = arith.addf %492, %287 : vector<2x128xf32>
    %494 = vector.extract_strided_slice %493 {offsets = [0, 0], sizes = [2, 32], strides = [1, 1]} : vector<2x128xf32> to vector<2x32xf32>
    %495 = arith.negf %494 : vector<2x32xf32>
    %496 = math.exp %495 : vector<2x32xf32>
    %cst_138 = arith.constant 1.000000e+00 : f32
    %497 = vector.broadcast %cst_138 : f32 to vector<2x32xf32>
    %498 = arith.addf %497, %496 : vector<2x32xf32>
    %499 = arith.divf %497, %498 : vector<2x32xf32>
    %500 = vector.extract_strided_slice %493 {offsets = [0, 32], sizes = [2, 32], strides = [1, 1]} : vector<2x128xf32> to vector<2x32xf32>
    %501 = arith.negf %500 : vector<2x32xf32>
    %502 = math.exp %501 : vector<2x32xf32>
    %cst_139 = arith.constant 1.000000e+00 : f32
    %503 = vector.broadcast %cst_139 : f32 to vector<2x32xf32>
    %504 = arith.addf %503, %502 : vector<2x32xf32>
    %505 = arith.divf %503, %504 : vector<2x32xf32>
    %506 = vector.extract_strided_slice %493 {offsets = [0, 64], sizes = [2, 32], strides = [1, 1]} : vector<2x128xf32> to vector<2x32xf32>
    %507 = math.tanh %506 : vector<2x32xf32>
    %508 = vector.extract_strided_slice %493 {offsets = [0, 96], sizes = [2, 32], strides = [1, 1]} : vector<2x128xf32> to vector<2x32xf32>
    %509 = arith.negf %508 : vector<2x32xf32>
    %510 = math.exp %509 : vector<2x32xf32>
    %cst_140 = arith.constant 1.000000e+00 : f32
    %511 = vector.broadcast %cst_140 : f32 to vector<2x32xf32>
    %512 = arith.addf %511, %510 : vector<2x32xf32>
    %513 = arith.divf %511, %512 : vector<2x32xf32>
    %514 = arith.mulf %505, %483 : vector<2x32xf32>
    %515 = arith.mulf %499, %507 : vector<2x32xf32>
    %516 = arith.addf %514, %515 : vector<2x32xf32>
    %517 = math.tanh %516 : vector<2x32xf32>
    %518 = arith.mulf %513, %517 : vector<2x32xf32>
    %519 = arith.index_cast %488 : i32 to index
    %c0_141 = arith.constant 0 : index
    %520 = vector.load %arg13[%519, %c0_141] : memref<16x32xf32, #tpu.memory_space<vmem>>, vector<2x32xf32>
    tpu.vector_store %arg13[%519, %c0_141], %518 {strides = array<i32>} : memref<16x32xf32, #tpu.memory_space<vmem>>, vector<2x32xf32>,
    %c7_i32_142 = arith.constant 7 : i32
    %c2_i32_143 = arith.constant 2 : i32
    %521 = arith.muli %c7_i32_142, %c2_i32_143 : i32
    %522 = arith.index_cast %521 : i32 to index
    %c0_144 = arith.constant 0 : index
    %523 = vector.load %arg12[%522, %c0_144] : memref<16x128xf32, #tpu.memory_space<vmem>>, vector<2x128xf32>
    %cst_145 = arith.constant dense<0.000000e+00> : vector<2x128xf32>
    %524 = tpu.matmul %518, %284, %cst_145 {dimension_numbers = #tpu.dot_dimension_numbers<[1], [0], [0], [1], [0, 0, 1, 1], [], []>} : vector<2x32xf32>, vector<32x128xf32>, vector<2x128xf32> -> vector<2x128xf32>
    %525 = arith.addf %523, %524 : vector<2x128xf32>
    %526 = arith.addf %525, %287 : vector<2x128xf32>
    %527 = vector.extract_strided_slice %526 {offsets = [0, 0], sizes = [2, 32], strides = [1, 1]} : vector<2x128xf32> to vector<2x32xf32>
    %528 = arith.negf %527 : vector<2x32xf32>
    %529 = math.exp %528 : vector<2x32xf32>
    %cst_146 = arith.constant 1.000000e+00 : f32
    %530 = vector.broadcast %cst_146 : f32 to vector<2x32xf32>
    %531 = arith.addf %530, %529 : vector<2x32xf32>
    %532 = arith.divf %530, %531 : vector<2x32xf32>
    %533 = vector.extract_strided_slice %526 {offsets = [0, 32], sizes = [2, 32], strides = [1, 1]} : vector<2x128xf32> to vector<2x32xf32>
    %534 = arith.negf %533 : vector<2x32xf32>
    %535 = math.exp %534 : vector<2x32xf32>
    %cst_147 = arith.constant 1.000000e+00 : f32
    %536 = vector.broadcast %cst_147 : f32 to vector<2x32xf32>
    %537 = arith.addf %536, %535 : vector<2x32xf32>
    %538 = arith.divf %536, %537 : vector<2x32xf32>
    %539 = vector.extract_strided_slice %526 {offsets = [0, 64], sizes = [2, 32], strides = [1, 1]} : vector<2x128xf32> to vector<2x32xf32>
    %540 = math.tanh %539 : vector<2x32xf32>
    %541 = vector.extract_strided_slice %526 {offsets = [0, 96], sizes = [2, 32], strides = [1, 1]} : vector<2x128xf32> to vector<2x32xf32>
    %542 = arith.negf %541 : vector<2x32xf32>
    %543 = math.exp %542 : vector<2x32xf32>
    %cst_148 = arith.constant 1.000000e+00 : f32
    %544 = vector.broadcast %cst_148 : f32 to vector<2x32xf32>
    %545 = arith.addf %544, %543 : vector<2x32xf32>
    %546 = arith.divf %544, %545 : vector<2x32xf32>
    %547 = arith.mulf %538, %516 : vector<2x32xf32>
    %548 = arith.mulf %532, %540 : vector<2x32xf32>
    %549 = arith.addf %547, %548 : vector<2x32xf32>
    %550 = math.tanh %549 : vector<2x32xf32>
    %551 = arith.mulf %546, %550 : vector<2x32xf32>
    %552 = arith.index_cast %521 : i32 to index
    %c0_149 = arith.constant 0 : index
    %553 = vector.load %arg13[%552, %c0_149] : memref<16x32xf32, #tpu.memory_space<vmem>>, vector<2x32xf32>
    tpu.vector_store %arg13[%552, %c0_149], %551 {strides = array<i32>} : memref<16x32xf32, #tpu.memory_space<vmem>>, vector<2x32xf32>,
    %c8_i32_150 = arith.constant 8 : i32
    %c1 = arith.constant 1 : index
    %c0_151 = arith.constant 0 : index
    %c0_152 = arith.constant 0 : index
    %554 = vector.load %arg10[%c1, %c0_151, %c0_152] : memref<2x2x32xf32, #tpu.memory_space<vmem>>, vector<1x2x32xf32>
    %555 = vector.shape_cast %554 : vector<1x2x32xf32> to vector<2x32xf32>
    %556 = vector.shape_cast %551 : vector<2x32xf32> to vector<1x2x32xf32>
    tpu.vector_store %arg10[%c1, %c0_151, %c0_152], %556 {strides = array<i32>} : memref<2x2x32xf32, #tpu.memory_space<vmem>>, vector<1x2x32xf32>,
    %c1_153 = arith.constant 1 : index
    %c0_154 = arith.constant 0 : index
    %c0_155 = arith.constant 0 : index
    %557 = vector.load %arg11[%c1_153, %c0_154, %c0_155] : memref<2x2x32xf32, #tpu.memory_space<vmem>>, vector<1x2x32xf32>
    %558 = vector.shape_cast %557 : vector<1x2x32xf32> to vector<2x32xf32>
    %559 = vector.shape_cast %549 : vector<2x32xf32> to vector<1x2x32xf32>
    tpu.vector_store %arg11[%c1_153, %c0_154, %c0_155], %559 {strides = array<i32>} : memref<2x2x32xf32, #tpu.memory_space<vmem>>, vector<1x2x32xf32>,
    %c0_156 = arith.constant 0 : index
    %c0_157 = arith.constant 0 : index
    %560 = vector.load %arg7[%c0_156, %c0_157] : memref<32x16xf32, #tpu.memory_space<vmem>>, vector<32x16xf32>
    %cst_158 = arith.constant dense<0.000000e+00> : vector<2x16xf32>
    %561 = tpu.matmul %551, %560, %cst_158 {dimension_numbers = #tpu.dot_dimension_numbers<[1], [0], [0], [1], [0, 0, 1, 1], [], []>} : vector<2x32xf32>, vector<32x16xf32>, vector<2x16xf32> -> vector<2x16xf32>
    %c0_159 = arith.constant 0 : index
    %c0_160 = arith.constant 0 : index
    %562 = vector.load %arg8[%c0_159, %c0_160] : memref<1x16xf32, #tpu.memory_space<vmem>>, vector<1x16xf32>
    %563 = vector.broadcast %562 : vector<1x16xf32> to vector<2x16xf32>
    %564 = arith.addf %561, %563 : vector<2x16xf32>
    %c0_161 = arith.constant 0 : index
    %c0_162 = arith.constant 0 : index
    %565 = vector.load %arg9[%c0_161, %c0_162] : memref<2x16xf32, #tpu.memory_space<vmem>>, vector<2x16xf32>
    tpu.vector_store %arg9[%c0_161, %c0_162], %564 {strides = array<i32>} : memref<2x16xf32, #tpu.memory_space<vmem>>, vector<2x16xf32>,
    return
  }
}

</mosaic_0001>

<bundles_post_ra>
// kernel: base_model_forward.1
= control target key start
LH: loop header
LB: loop body
LE: loop exit
PB: predicated region body
PF: predicated region fallthrough
CT: control target
= control target key end

     0   :  { %17 = vsyncpa [#allocation5], 0  ;;  %vm43_vm0 = vcmask 261120   ;;  %v2716_v6 = vmov 0.0|0.0   ;;  %vm2717_vm1 = vmmov 0   ;;  %v2718_v11 = vmov 0.0   ;;  %s3138_s0 = inlined_call_operand.vmem [shape: f32[16,32], index: 0, kind: input, shape index: {}]   ;;  %s3139_s1 = inlined_call_operand.vmem [shape: f32[32,128], index: 1, kind: input, shape index: {}]   ;;  %s3140_s2 = inlined_call_operand.vmem [shape: f32[32,128], index: 2, kind: input, shape index: {}]   ;;  %s3141_s3 = inlined_call_operand.vmem [shape: f32[1,128], index: 3, kind: input, shape index: {}]   ;;  %s3142_s4 = inlined_call_operand.vmem [shape: f32[32,128], index: 4, kind: input, shape index: {}]   ;;  %s3143_s5 = inlined_call_operand.vmem [shape: f32[32,128], index: 5, kind: input, shape index: {}]   ;;  %s3144_s6 = inlined_call_operand.vmem [shape: f32[1,128], index: 6, kind: input, shape index: {}]   ;;  %s3145_s7 = inlined_call_operand.vmem [shape: f32[32,16], index: 7, kind: input, shape index: {}]   ;;  %s3146_s8 = inlined_call_operand.vmem [shape: f32[1,16], index: 8, kind: input, shape index: {}]   ;;  %s3147_s9 = inlined_call_operand.hbm [shape: f32[2,16], index: 9, kind: output, shape index: {0}]   ;;  %s3148_s10 = inlined_call_operand.hbm [shape: f32[2,2,32], index: 10, kind: output, shape index: {1}]   ;;  %s3149_s11 = inlined_call_operand.hbm [shape: f32[2,2,32], index: 11, kind: output, shape index: {2}]  }
   0x1   :  { %v39_v0 = vld [vmem:[%s3139_s1] sm:$0xff]  ;;  %v40_v1 = vld [vmem:[%s3139_s1 + $0x8] sm:$0xff]  ;;  %v41_v2 = vld [vmem:[%s3139_s1 + $0x10] sm:$0xff]  ;;  %2398 = vmatprep.subr.bf16.mxu1 %v2716_v6  ;;  %2200 = vmatprep.mubr.msk.f32.mxu1 %vm2717_vm1, %v2718_v11 }
   0x2   :  { %v2390_v3 = vpack.c.bf16 %v40_v1, %v39_v0  ;;  %v42_v4 = vld [vmem:[%s3139_s1 + $0x18] sm:$0xff]  ;;  %v37_v5 = vld [vmem:[%s3138_s0] sm:$0xff]  ;;  %v128_v9 = vld [vmem:[%s3140_s2 + $0x8] sm:$0xff] }
   0x3   :  { %v2394_v7 = vpack.c.bf16 %v42_v4, %v41_v2  ;;  %2189 = vmatprep.mubr.msk.f32.mxu0 %vm43_vm0, %v37_v5  ;;  %v127_v8 = vld [vmem:[%s3140_s2] sm:$0xff]  ;;  %v129_v10 = vld [vmem:[%s3140_s2 + $0x10] sm:$0xff]  ;;  %v130_v13 = vld [vmem:[%s3140_s2 + $0x18] sm:$0xff] }
   0x4   :  { %2391 = vmatprep.subr.bf16.mxu0 %v2390_v3  ;;  %v2814_v12 = vpack.c.bf16 %v128_v9, %v127_v8 }
   0x5   :  { %18 = vsyncpa [#allocation7], 0  ;;  %2393 = vmatpush3.bf16.msra.mxu0 %v2390_v3  ;;  %v2820_v14 = vpack.c.bf16 %v130_v13, %v129_v10  ;;  %v38_v15 = vld [vmem:[%s3138_s0 + $0x8] sm:$0xff]  ;;  %v2846_v20 = vld [vmem:[%s3141_s3] ss:$0 sm:$0xff]  ;;  %s2719_s17 = smov 64  }
   0x6   :  { %2395 = vmatprep.subr.bf16.mxu0 %v2394_v7  ;;  %2400 = vmatpush3.bf16.msra.mxu1 %v2814_v12  ;;  %s2720_s18 = smov 32   ;;  %vm242_vm2 = vcmask 254976   ;;  %s2721_s20 = smov 96  }
   0x7   :  { %2401 = vmatprep.subr.bf16.mxu1 %v2716_v6 }
   0x9   :  { %2397 = vmatpush3.bf16.msra.mxu0 %v2394_v7 }
   0xa   :  { %2403 = vmatpush3.bf16.msra.mxu1 %v2820_v14  ;;  %2404 = vmatprep.subr.bf16.mxu0 %v2716_v6 }
   0xb   :  { %2410 = vmatprep.subr.bf16.mxu1 %v2716_v6 }
   0xc   :  { %2190 = vmatmul.mubr.msk.f32.vlgmr.msra.gmra.mrb[0].mxu0 %vm43_vm0, %v38_v15 }
   0xd   :  { %2201 = vmatmul.mubr.f32.vlgmr.msra.gmra.mrb[0].mxu1 %v2718_v11  ;;  %2406 = vmatpush3.bf16.msra.mxu0 %v2814_v12 }
   0xe   :  { %2407 = vmatprep.subr.bf16.mxu0 %v2716_v6  ;;  %2211 = vmatprep.mubr.msk.f32.mxu0 %vm2717_vm1, %v2718_v11 }
   0xf   :  { %2412 = vmatpush3.bf16.msra.mxu1 %v2814_v12  ;;  %2222 = vmatprep.mubr.msk.f32.mxu1 %vm2717_vm1, %v2718_v11 }
  0x10   :  { %2413 = vmatprep.subr.bf16.mxu1 %v2716_v6 }
  0x11   :  { %2409 = vmatpush3.bf16.msra.mxu0 %v2820_v14 }
  0x12   :  { %2416 = vmatprep.subr.bf16.mxu0 %v2716_v6 }
  0x13   :  { %2415 = vmatpush3.bf16.msra.mxu1 %v2820_v14 }
  0x14   :  { %2422 = vmatprep.subr.bf16.mxu1 %v2716_v6 }
  0xdf   :  { %v2191_v16 = vpop.f32.mrb[0].mxu0 }
  0xe0   :  { %126 = vst [vmem:[#allocation2 + $0x8] sm:$0xff] %v2191_v16  ;;  %v116_v17 = vpop.f32.mrb[1].mxu0  ;;  %v208_v18 = vpop.f32.mrb[0].mxu1 }
  0xe1   :  { %125 = vst [vmem:[#allocation2] sm:$0xff] %v116_v17  ;;  %v2202_v19 = vpop.f32.mrb[1].mxu1 }
  0xe8   :  { %v138_v21 = vld [vmem:[#allocation2] sm:$0x3]  ;;  %v244_v38 = vld [vmem:[#allocation2 + $0x2] sm:$0x3]  ;;  %v348_v57 = vld [vmem:[#allocation2 + $0x4] sm:$0x3] }
  0xe9   :  { %v212_v22 = vadd.f32 %v208_v18, %v138_v21  ;;  %v452_v16 = vld [vmem:[#allocation2 + $0x6] sm:$0x3] }
  0xeb   :  { %v213_v23 = vadd.f32 %v2846_v20, %v212_v22 }
  0xed   :  { %2518 = vtanh.f32 %v213_v23  ;;  %v2049_v25 = vmul.f32 -1.442695, %v213_v23 }
  0xef   :  { %2520 = vpow2.f32 %v2049_v25 }
  0xf7   :  { %v2519_v24 = vpop.eup %2518 }
  0xf8   :  { %223 = vrot.lane.b32.xlu0 %v2519_v24, %s2719_s17 }
  0xf9   :  { %v2521_v26 = vpop.eup %2520 }
  0xfa   :  { %v217_v27 = vadd.f32 1.0, %v2521_v26 }
  0xfc   :  { %2522 = vrcp.f32 %v217_v27 }
 0x106   :  { %v2523_v28 = vpop.eup %2522 }
 0x107   :  { %v221_v31 = vmul.f32 0.0, %v2523_v28 }
 0x16a   :  { %v224_v29 = vpop.permute.xlu0 %223 }
 0x16b   :  { %v226_v30 = vmul.f32 %v2523_v28, %v224_v29 }
 0x16d   :  { %228 = vrot.lane.b32.xlu0 %v226_v30, %s2720_s18 }
 0x1df   :  { %v229_v32 = vpop.permute.xlu0 %228 }
 0x1e0   :  { %v231_v33 = vadd.f32 %v229_v32, %v221_v31 }
 0x1e2   :  { %2524 = vtanh.f32 %v231_v33 }
 0x1ec   :  { %v2525_v34 = vpop.eup %2524 }
 0x1ed   :  { %234 = vrot.lane.b32.xlu1 %v2525_v34, %s2719_s17 }
 0x25f   :  { %v235_v35 = vpop.permute.xlu1 %234 }
 0x260   :  { %v237_v36 = vmul.f32 %v2523_v28, %v235_v35 }
 0x262   :  { %239 = vrot.lane.b32.xlu1 %v237_v36, %s2720_s18  ;;  %v556_v36 = vld [vmem:[#allocation2 + $0x8] sm:$0x3] }
 0x2d4   :  { %v240_v37 = vpop.permute.xlu1 %239 }
 0x2d5   :  { %243 = vst.msk [vmem:[#allocation3] sm:$0x3] %vm242_vm2, %v240_v37  ;;  %2212 = vmatmul.mubr.msk.f32.vlgmr.msra.gmra.mrb[2].mxu0 %vm43_vm0, %v240_v37 }
 0x2d6   :  { %2418 = vmatpush3.bf16.msra.mxu0 %v2814_v12  ;;  %2233 = vmatprep.mubr.msk.f32.mxu0 %vm2717_vm1, %v2718_v11 }
 0x2d7   :  { %2419 = vmatprep.subr.bf16.mxu0 %v2716_v6 }
 0x2da   :  { %2421 = vmatpush3.bf16.msra.mxu0 %v2820_v14 }
 0x2db   :  { %2428 = vmatprep.subr.bf16.mxu0 %v2716_v6 }
 0x3a8   :  { %v313_v39 = vpop.f32.mrb[2].mxu0 }
 0x3a9   :  { %v317_v40 = vadd.f32 %v313_v39, %v244_v38  ;;  %v2213_v41 = vpop.f32.mrb[3].mxu0 }
 0x3ab   :  { %v318_v42 = vadd.f32 %v2846_v20, %v317_v40 }
 0x3ad   :  { %2526 = vtanh.f32 %v318_v42  ;;  %v2051_v44 = vmul.f32 -1.442695, %v318_v42 }
 0x3af   :  { %2528 = vpow2.f32 %v2051_v44 }
 0x3b7   :  { %v2527_v43 = vpop.eup %2526 }
 0x3b8   :  { %328 = vrot.lane.b32.xlu0 %v2527_v43, %s2719_s17 }
 0x3b9   :  { %v2529_v45 = vpop.eup %2528 }
 0x3ba   :  { %v322_v46 = vadd.f32 1.0, %v2529_v45 }
 0x3bc   :  { %2530 = vrcp.f32 %v322_v46 }
 0x3c6   :  { %v2531_v47 = vpop.eup %2530 }
 0x3c7   :  { %v326_v50 = vmul.f32 %v2531_v47, %v231_v33 }
 0x42a   :  { %v329_v48 = vpop.permute.xlu0 %328 }
 0x42b   :  { %v331_v49 = vmul.f32 %v2531_v47, %v329_v48 }
 0x42d   :  { %333 = vrot.lane.b32.xlu1 %v331_v49, %s2720_s18 }
 0x49f   :  { %v334_v51 = vpop.permute.xlu1 %333 }
 0x4a0   :  { %v336_v52 = vadd.f32 %v334_v51, %v326_v50 }
 0x4a2   :  { %2532 = vtanh.f32 %v336_v52 }
 0x4ac   :  { %v2533_v53 = vpop.eup %2532 }
 0x4ad   :  { %339 = vrot.lane.b32.xlu0 %v2533_v53, %s2719_s17 }
 0x51f   :  { %v340_v54 = vpop.permute.xlu0 %339 }
 0x520   :  { %v342_v55 = vmul.f32 %v2531_v47, %v340_v54 }
 0x522   :  { %344 = vrot.lane.b32.xlu1 %v342_v55, %s2720_s18  ;;  %v660_v55 = vld [vmem:[#allocation2 + $0xa] sm:$0x3] }
 0x594   :  { %v345_v56 = vpop.permute.xlu1 %344 }
 0x595   :  { %347 = vst.msk [vmem:[#allocation3 + $0x2] sm:$0x3] %vm242_vm2, %v345_v56  ;;  %2223 = vmatmul.mubr.msk.f32.vlgmr.msra.gmra.mrb[2].mxu1 %vm43_vm0, %v345_v56 }
 0x596   :  { %2424 = vmatpush3.bf16.msra.mxu1 %v2814_v12  ;;  %2244 = vmatprep.mubr.msk.f32.mxu1 %vm2717_vm1, %v2718_v11 }
 0x597   :  { %2425 = vmatprep.subr.bf16.mxu1 %v2716_v6 }
 0x59a   :  { %2427 = vmatpush3.bf16.msra.mxu1 %v2820_v14 }
 0x59b   :  { %2434 = vmatprep.subr.bf16.mxu1 %v2716_v6 }
 0x668   :  { %v417_v58 = vpop.f32.mrb[2].mxu1 }
 0x669   :  { %v421_v59 = vadd.f32 %v417_v58, %v348_v57  ;;  %v2224_v60 = vpop.f32.mrb[3].mxu1 }
 0x66b   :  { %v422_v61 = vadd.f32 %v2846_v20, %v421_v59 }
 0x66d   :  { %2534 = vtanh.f32 %v422_v61  ;;  %v2053_v63 = vmul.f32 -1.442695, %v422_v61 }
 0x66f   :  { %2536 = vpow2.f32 %v2053_v63 }
 0x677   :  { %v2535_v62 = vpop.eup %2534 }
 0x678   :  { %432 = vrot.lane.b32.xlu0 %v2535_v62, %s2719_s17 }
 0x679   :  { %v2537_v0 = vpop.eup %2536 }
 0x67a   :  { %v426_v1 = vadd.f32 1.0, %v2537_v0 }
 0x67c   :  { %2538 = vrcp.f32 %v426_v1 }
 0x686   :  { %v2539_v2 = vpop.eup %2538 }
 0x687   :  { %v430_v5 = vmul.f32 %v2539_v2, %v336_v52 }
 0x6ea   :  { %v433_v3 = vpop.permute.xlu0 %432 }
 0x6eb   :  { %v435_v4 = vmul.f32 %v2539_v2, %v433_v3 }
 0x6ed   :  { %437 = vrot.lane.b32.xlu1 %v435_v4, %s2720_s18 }
 0x75f   :  { %v438_v7 = vpop.permute.xlu1 %437 }
 0x760   :  { %v440_v8 = vadd.f32 %v438_v7, %v430_v5 }
 0x762   :  { %2540 = vtanh.f32 %v440_v8 }
 0x76c   :  { %v2541_v9 = vpop.eup %2540 }
 0x76d   :  { %443 = vrot.lane.b32.xlu0 %v2541_v9, %s2719_s17 }
 0x7df   :  { %v444_v10 = vpop.permute.xlu0 %443 }
 0x7e0   :  { %v446_v13 = vmul.f32 %v2539_v2, %v444_v10  ;;  %v764_v10 = vld [vmem:[#allocation2 + $0xc] sm:$0x3] }
 0x7e2   :  { %448 = vrot.lane.b32.xlu1 %v446_v13, %s2720_s18 }
 0x854   :  { %v449_v15 = vpop.permute.xlu1 %448 }
 0x855   :  { %451 = vst.msk [vmem:[#allocation3 + $0x4] sm:$0x3] %vm242_vm2, %v449_v15  ;;  %2234 = vmatmul.mubr.msk.f32.vlgmr.msra.gmra.mrb[4].mxu0 %vm43_vm0, %v449_v15 }
 0x856   :  { %2430 = vmatpush3.bf16.msra.mxu0 %v2814_v12  ;;  %2255 = vmatprep.mubr.msk.f32.mxu0 %vm2717_vm1, %v2718_v11 }
 0x857   :  { %2431 = vmatprep.subr.bf16.mxu0 %v2716_v6 }
 0x85a   :  { %2433 = vmatpush3.bf16.msra.mxu0 %v2820_v14 }
 0x85b   :  { %2440 = vmatprep.subr.bf16.mxu0 %v2716_v6 }
 0x928   :  { %v521_v17 = vpop.f32.mrb[4].mxu0 }
 0x929   :  { %v525_v18 = vadd.f32 %v521_v17, %v452_v16  ;;  %v2235_v19 = vpop.f32.mrb[5].mxu0 }
 0x92b   :  { %v526_v21 = vadd.f32 %v2846_v20, %v525_v18 }
 0x92d   :  { %2542 = vtanh.f32 %v526_v21  ;;  %v2055_v23 = vmul.f32 -1.442695, %v526_v21 }
 0x92f   :  { %2544 = vpow2.f32 %v2055_v23 }
 0x937   :  { %v2543_v22 = vpop.eup %2542 }
 0x938   :  { %536 = vrot.lane.b32.xlu0 %v2543_v22, %s2719_s17 }
 0x939   :  { %v2545_v24 = vpop.eup %2544 }
 0x93a   :  { %v530_v25 = vadd.f32 1.0, %v2545_v24 }
 0x93c   :  { %2546 = vrcp.f32 %v530_v25 }
 0x946   :  { %v2547_v26 = vpop.eup %2546 }
 0x947   :  { %v534_v29 = vmul.f32 %v2547_v26, %v440_v8 }
 0x9aa   :  { %v537_v27 = vpop.permute.xlu0 %536 }
 0x9ab   :  { %v539_v28 = vmul.f32 %v2547_v26, %v537_v27 }
 0x9ad   :  { %541 = vrot.lane.b32.xlu1 %v539_v28, %s2720_s18 }
 0xa1f   :  { %v542_v30 = vpop.permute.xlu1 %541 }
 0xa20   :  { %v544_v31 = vadd.f32 %v542_v30, %v534_v29 }
 0xa22   :  { %2548 = vtanh.f32 %v544_v31 }
 0xa2c   :  { %v2549_v32 = vpop.eup %2548 }
 0xa2d   :  { %547 = vrot.lane.b32.xlu0 %v2549_v32, %s2719_s17 }
 0xa9f   :  { %v548_v33 = vpop.permute.xlu0 %547 }
 0xaa0   :  { %v550_v34 = vmul.f32 %v2547_v26, %v548_v33  ;;  %v868_v33 = vld [vmem:[#allocation2 + $0xe] sm:$0x3] }
 0xaa2   :  { %552 = vrot.lane.b32.xlu1 %v550_v34, %s2720_s18 }
 0xb14   :  { %v553_v35 = vpop.permute.xlu1 %552 }
 0xb15   :  { %555 = vst.msk [vmem:[#allocation3 + $0x6] sm:$0x3] %vm242_vm2, %v553_v35  ;;  %2245 = vmatmul.mubr.msk.f32.vlgmr.msra.gmra.mrb[4].mxu1 %vm43_vm0, %v553_v35 }
 0xb16   :  { %2436 = vmatpush3.bf16.msra.mxu1 %v2814_v12  ;;  %2266 = vmatprep.mubr.msk.f32.mxu1 %vm2717_vm1, %v2718_v11 }
 0xb17   :  { %2437 = vmatprep.subr.bf16.mxu1 %v2716_v6 }
 0xb1a   :  { %2439 = vmatpush3.bf16.msra.mxu1 %v2820_v14 }
 0xb1c   :  { %v978_v9 = vld [vmem:[#allocation3] sm:$0xff] }
 0xbe8   :  { %v625_v37 = vpop.f32.mrb[4].mxu1 }
 0xbe9   :  { %v629_v38 = vadd.f32 %v625_v37, %v556_v36  ;;  %v2246_v39 = vpop.f32.mrb[5].mxu1 }
 0xbeb   :  { %v630_v40 = vadd.f32 %v2846_v20, %v629_v38 }
 0xbed   :  { %2550 = vtanh.f32 %v630_v40  ;;  %v2057_v42 = vmul.f32 -1.442695, %v630_v40 }
 0xbef   :  { %2552 = vpow2.f32 %v2057_v42 }
 0xbf7   :  { %v2551_v41 = vpop.eup %2550 }
 0xbf8   :  { %640 = vrot.lane.b32.xlu0 %v2551_v41, %s2719_s17 }
 0xbf9   :  { %v2553_v43 = vpop.eup %2552 }
 0xbfa   :  { %v634_v44 = vadd.f32 1.0, %v2553_v43 }
 0xbfc   :  { %2554 = vrcp.f32 %v634_v44 }
 0xc06   :  { %v2555_v45 = vpop.eup %2554 }
 0xc07   :  { %v638_v48 = vmul.f32 %v2555_v45, %v544_v31 }
 0xc6a   :  { %v641_v46 = vpop.permute.xlu0 %640 }
 0xc6b   :  { %v643_v47 = vmul.f32 %v2555_v45, %v641_v46 }
 0xc6d   :  { %645 = vrot.lane.b32.xlu1 %v643_v47, %s2720_s18 }
 0xcdf   :  { %v646_v49 = vpop.permute.xlu1 %645 }
 0xce0   :  { %v648_v50 = vadd.f32 %v646_v49, %v638_v48  ;;  %v980_v48 = vld [vmem:[%s3142_s4] sm:$0xff]  ;;  %v981_v49 = vld [vmem:[%s3142_s4 + $0x8] sm:$0xff] }
 0xce2   :  { %2556 = vtanh.f32 %v648_v50 }
 0xcec   :  { %v2557_v51 = vpop.eup %2556 }
 0xced   :  { %651 = vrot.lane.b32.xlu0 %v2557_v51, %s2719_s17  ;;  %v982_v51 = vld [vmem:[%s3142_s4 + $0x10] sm:$0xff] }
 0xd5f   :  { %v652_v52 = vpop.permute.xlu0 %651 }
 0xd60   :  { %v654_v53 = vmul.f32 %v2555_v45, %v652_v52  ;;  %v983_v52 = vld [vmem:[%s3142_s4 + $0x18] sm:$0xff] }
 0xd62   :  { %656 = vrot.lane.b32.xlu1 %v654_v53, %s2720_s18  ;;  %v2450_v53 = vpack.c.bf16 %v983_v52, %v982_v51 }
 0xdd4   :  { %v657_v54 = vpop.permute.xlu1 %656 }
 0xdd5   :  { %659 = vst.msk [vmem:[#allocation3 + $0x8] sm:$0x3] %vm242_vm2, %v657_v54  ;;  %2256 = vmatmul.mubr.msk.f32.vlgmr.msra.gmra.mrb[6].mxu0 %vm43_vm0, %v657_v54  ;;  %v1067_v54 = vld [vmem:[%s3143_s5] sm:$0xff] }
 0xdd6   :  { %2442 = vmatpush3.bf16.msra.mxu0 %v2814_v12  ;;  %2277 = vmatprep.mubr.msk.f32.mxu0 %vm2717_vm1, %v2718_v11 }
 0xdd7   :  { %2443 = vmatprep.subr.bf16.mxu0 %v2716_v6 }
 0xdda   :  { %2445 = vmatpush3.bf16.msra.mxu0 %v2820_v14 }
 0xddb   :  { %2454 = vmatprep.subr.bf16.mxu0 %v2716_v6 }
 0xea8   :  { %v729_v56 = vpop.f32.mrb[6].mxu0 }
 0xea9   :  { %v733_v57 = vadd.f32 %v729_v56, %v660_v55  ;;  %v2257_v58 = vpop.f32.mrb[7].mxu0  ;;  %v1068_v55 = vld [vmem:[%s3143_s5 + $0x8] sm:$0xff]  ;;  %v1069_v56 = vld [vmem:[%s3143_s5 + $0x10] sm:$0xff] }
 0xeaa   :  { %v1070_v58 = vld [vmem:[%s3143_s5 + $0x18] sm:$0xff] }
 0xeab   :  { %v734_v59 = vadd.f32 %v2846_v20, %v733_v57  ;;  %v2958_v57 = vpack.c.bf16 %v1068_v55, %v1067_v54 }
 0xead   :  { %2558 = vtanh.f32 %v734_v59  ;;  %v2059_v12 = vmul.f32 -1.442695, %v734_v59 }
 0xeaf   :  { %2560 = vpow2.f32 %v2059_v12  ;;  %v2964_v12 = vpack.c.bf16 %v1070_v58, %v1069_v56 }
 0xeb7   :  { %v2559_v60 = vpop.eup %2558 }
 0xeb8   :  { %744 = vrot.lane.b32.xlu0 %v2559_v60, %s2719_s17 }
 0xeb9   :  { %v2561_v61 = vpop.eup %2560 }
 0xeba   :  { %v738_v62 = vadd.f32 1.0, %v2561_v61 }
 0xebc   :  { %2562 = vrcp.f32 %v738_v62 }
 0xec6   :  { %v2563_v63 = vpop.eup %2562 }
 0xec7   :  { %v742_v1 = vmul.f32 %v2563_v63, %v648_v50  ;;  %v2446_v50 = vpack.c.bf16 %v981_v49, %v980_v48 }
 0xec9   :  { %2447 = vmatprep.subr.bf16.mxu1 %v2446_v50 }
 0xf2a   :  { %v745_v0 = vpop.permute.xlu0 %744 }
 0xf2b   :  { %v747_v14 = vmul.f32 %v2563_v63, %v745_v0 }
 0xf2d   :  { %749 = vrot.lane.b32.xlu1 %v747_v14, %s2720_s18 }
 0xf9f   :  { %v750_v2 = vpop.permute.xlu1 %749 }
 0xfa0   :  { %v752_v3 = vadd.f32 %v750_v2, %v742_v1  ;;  %v2989_v2 = vld [vmem:[%s3144_s6] ss:$0 sm:$0xff] }
 0xfa2   :  { %2564 = vtanh.f32 %v752_v3 }
 0xfac   :  { %v2565_v4 = vpop.eup %2564 }
 0xfad   :  { %755 = vrot.lane.b32.xlu0 %v2565_v4, %s2719_s17 }
0x101f   :  { %v756_v5 = vpop.permute.xlu0 %755 }
0x1020   :  { %v758_v7 = vmul.f32 %v2563_v63, %v756_v5 }
0x1022   :  { %760 = vrot.lane.b32.xlu1 %v758_v7, %s2720_s18 }
0x1094   :  { %v761_v8 = vpop.permute.xlu1 %760 }
0x1095   :  { %763 = vst.msk [vmem:[#allocation3 + $0xa] sm:$0x3] %vm242_vm2, %v761_v8  ;;  %2267 = vmatmul.mubr.msk.f32.vlgmr.msra.gmra.mrb[6].mxu1 %vm43_vm0, %v761_v8 }
0x1096   :  { %2288 = vmatprep.mubr.msk.f32.mxu1 %vm43_vm0, %v978_v9  ;;  %2449 = vmatpush3.bf16.msra.mxu1 %v2446_v50 }
0x1097   :  { %2451 = vmatprep.subr.bf16.mxu1 %v2450_v53 }
0x109a   :  { %2453 = vmatpush3.bf16.msra.mxu1 %v2450_v53 }
0x109b   :  { %2460 = vmatprep.subr.bf16.mxu1 %v2716_v6 }
0x1168   :  { %v833_v13 = vpop.f32.mrb[6].mxu1 }
0x1169   :  { %v837_v15 = vadd.f32 %v833_v13, %v764_v10  ;;  %v2268_v16 = vpop.f32.mrb[7].mxu1 }
0x116b   :  { %v838_v17 = vadd.f32 %v2846_v20, %v837_v15 }
0x116d   :  { %2566 = vtanh.f32 %v838_v17  ;;  %v2061_v19 = vmul.f32 -1.442695, %v838_v17 }
0x116f   :  { %2568 = vpow2.f32 %v2061_v19 }
0x1177   :  { %v2567_v18 = vpop.eup %2566 }
0x1178   :  { %848 = vrot.lane.b32.xlu0 %v2567_v18, %s2719_s17 }
0x1179   :  { %v2569_v21 = vpop.eup %2568 }
0x117a   :  { %v842_v22 = vadd.f32 1.0, %v2569_v21 }
0x117c   :  { %2570 = vrcp.f32 %v842_v22 }
0x1186   :  { %v2571_v23 = vpop.eup %2570 }
0x1187   :  { %v846_v26 = vmul.f32 %v2571_v23, %v752_v3 }
0x11ea   :  { %v849_v24 = vpop.permute.xlu0 %848 }
0x11eb   :  { %v851_v25 = vmul.f32 %v2571_v23, %v849_v24 }
0x11ed   :  { %853 = vrot.lane.b32.xlu1 %v851_v25, %s2720_s18 }
0x125f   :  { %v854_v27 = vpop.permute.xlu1 %853 }
0x1260   :  { %v856_v28 = vadd.f32 %v854_v27, %v846_v26 }
0x1262   :  { %2572 = vtanh.f32 %v856_v28 }
0x126c   :  { %v2573_v29 = vpop.eup %2572 }
0x126d   :  { %859 = vrot.lane.b32.xlu0 %v2573_v29, %s2719_s17 }
0x12df   :  { %v860_v30 = vpop.permute.xlu0 %859 }
0x12e0   :  { %v862_v31 = vmul.f32 %v2571_v23, %v860_v30 }
0x12e2   :  { %864 = vrot.lane.b32.xlu1 %v862_v31, %s2720_s18 }
0x1354   :  { %v865_v32 = vpop.permute.xlu1 %864 }
0x1355   :  { %867 = vst.msk [vmem:[#allocation3 + $0xc] sm:$0x3] %vm242_vm2, %v865_v32  ;;  %2278 = vmatmul.mubr.msk.f32.vlgmr.msra.gmra.mrb[8].mxu0 %vm43_vm0, %v865_v32 }
0x1356   :  { %2299 = vmatprep.mubr.msk.f32.mxu0 %vm2717_vm1, %v2718_v11  ;;  %2456 = vmatpush3.bf16.msra.mxu0 %v2958_v57 }
0x1357   :  { %2457 = vmatprep.subr.bf16.mxu0 %v2716_v6 }
0x135a   :  { %2459 = vmatpush3.bf16.msra.mxu0 %v2964_v12 }
0x135b   :  { %2466 = vmatprep.subr.bf16.mxu0 %v2716_v6 }
0x135d   :  { %2300 = vmatmul.mubr.f32.vlgmr.msra.gmra.mrb[10].mxu0 %v2718_v11 }
0x135e   :  { %2468 = vmatpush3.bf16.msra.mxu0 %v2958_v57  ;;  %2321 = vmatprep.mubr.msk.f32.mxu0 %vm2717_vm1, %v2718_v11 }
0x135f   :  { %2469 = vmatprep.subr.bf16.mxu0 %v2716_v6 }
0x1362   :  { %2471 = vmatpush3.bf16.msra.mxu0 %v2964_v12 }
0x1363   :  { %2478 = vmatprep.subr.bf16.mxu0 %v2716_v6 }
0x1428   :  { %v937_v34 = vpop.f32.mrb[8].mxu0 }
0x1429   :  { %v941_v35 = vadd.f32 %v937_v34, %v868_v33  ;;  %v2279_v36 = vpop.f32.mrb[9].mxu0 }
0x142b   :  { %v942_v37 = vadd.f32 %v2846_v20, %v941_v35 }
0x142d   :  { %2574 = vtanh.f32 %v942_v37  ;;  %v2063_v39 = vmul.f32 -1.442695, %v942_v37 }
0x142f   :  { %2576 = vpow2.f32 %v2063_v39 }
0x1430   :  { %v1145_v63 = vpop.f32.mrb[10].mxu0 }
0x1431   :  { %v2301_v0 = vpop.f32.mrb[11].mxu0 }
0x1437   :  { %v2575_v38 = vpop.eup %2574 }
0x1438   :  { %952 = vrot.lane.b32.xlu0 %v2575_v38, %s2719_s17 }
0x1439   :  { %v2577_v40 = vpop.eup %2576 }
0x143a   :  { %v946_v41 = vadd.f32 1.0, %v2577_v40 }
0x143c   :  { %2578 = vrcp.f32 %v946_v41 }
0x1446   :  { %v2579_v42 = vpop.eup %2578 }
0x1447   :  { %v950_v45 = vmul.f32 %v2579_v42, %v856_v28 }
0x14aa   :  { %v953_v43 = vpop.permute.xlu0 %952 }
0x14ab   :  { %v955_v44 = vmul.f32 %v2579_v42, %v953_v43 }
0x14ad   :  { %957 = vrot.lane.b32.xlu1 %v955_v44, %s2720_s18 }
0x151f   :  { %v958_v46 = vpop.permute.xlu1 %957 }
0x1520   :  { %v2932_v47 = vadd.f32 %v958_v46, %v950_v45 }
0x1522   :  { %2580 = vtanh.f32 %v2932_v47 }
0x152c   :  { %v2581_v20 = vpop.eup %2580 }
0x152d   :  { %963 = vrot.lane.b32.xlu0 %v2581_v20, %s2719_s17 }
0x159f   :  { %v964_v59 = vpop.permute.xlu0 %963 }
0x15a0   :  { %v966_v60 = vmul.f32 %v2579_v42, %v964_v59 }
0x15a2   :  { %968 = vrot.lane.b32.xlu1 %v966_v60, %s2720_s18 }
0x1614   :  { %v969_v61 = vpop.permute.xlu1 %968 }
0x1615   :  { %971 = vst.msk [vmem:[#allocation3 + $0xe] sm:$0x3] %vm242_vm2, %v969_v61  ;;  %972 = vst.msk [vmem:[#allocation6] sm:$0x3] %vm242_vm2, %v969_v61 }
0x161c   :  { %v979_v62 = vld [vmem:[#allocation3 + $0x8] sm:$0xff] }
0x161d   :  { %2289 = vmatmul.mubr.msk.f32.vlgmr.msra.gmra.mrb[8].mxu1 %vm43_vm0, %v979_v62 }
0x161e   :  { %2462 = vmatpush3.bf16.msra.mxu1 %v2958_v57  ;;  %2310 = vmatprep.mubr.msk.f32.mxu1 %vm2717_vm1, %v2718_v11 }
0x161f   :  { %2463 = vmatprep.subr.bf16.mxu1 %v2716_v6 }
0x1622   :  { %2465 = vmatpush3.bf16.msra.mxu1 %v2964_v12 }
0x1623   :  { %2472 = vmatprep.subr.bf16.mxu1 %v2716_v6 }
0x16f0   :  { %v2290_v14 = vpop.f32.mrb[8].mxu1 }
0x16f1   :  { %1066 = vst [vmem:[#allocation2 + $0x8] sm:$0xff] %v2290_v14  ;;  %v1056_v1 = vpop.f32.mrb[9].mxu1 }
0x16f2   :  { %1065 = vst [vmem:[#allocation2] sm:$0xff] %v1056_v1 }
0x16f9   :  { %v1078_v3 = vld [vmem:[#allocation2] sm:$0x3]  ;;  %v1180_v25 = vld [vmem:[#allocation2 + $0x2] sm:$0x3]  ;;  %v1284_v44 = vld [vmem:[#allocation2 + $0x4] sm:$0x3] }
0x16fa   :  { %v1149_v4 = vadd.f32 %v1145_v63, %v1078_v3  ;;  %v1388_v0 = vld [vmem:[#allocation2 + $0x6] sm:$0x3] }
0x16fc   :  { %v1150_v5 = vadd.f32 %v2989_v2, %v1149_v4 }
0x16fe   :  { %2582 = vtanh.f32 %v1150_v5  ;;  %v2067_v8 = vmul.f32 -1.442695, %v1150_v5 }
0x1700   :  { %2584 = vpow2.f32 %v2067_v8 }
0x1708   :  { %v2583_v7 = vpop.eup %2582 }
0x1709   :  { %1160 = vrot.lane.b32.xlu0 %v2583_v7, %s2719_s17 }
0x170a   :  { %v2585_v9 = vpop.eup %2584 }
0x170b   :  { %v1154_v10 = vadd.f32 1.0, %v2585_v9 }
0x170d   :  { %2586 = vrcp.f32 %v1154_v10 }
0x1717   :  { %v2587_v13 = vpop.eup %2586 }
0x1718   :  { %v1158_v17 = vmul.f32 0.0, %v2587_v13 }
0x177b   :  { %v1161_v15 = vpop.permute.xlu0 %1160 }
0x177c   :  { %v1163_v16 = vmul.f32 %v2587_v13, %v1161_v15 }
0x177e   :  { %1165 = vrot.lane.b32.xlu1 %v1163_v16, %s2720_s18 }
0x17f0   :  { %v1166_v18 = vpop.permute.xlu1 %1165 }
0x17f1   :  { %v1168_v19 = vadd.f32 %v1166_v18, %v1158_v17 }
0x17f3   :  { %2588 = vtanh.f32 %v1168_v19 }
0x17fd   :  { %v2589_v21 = vpop.eup %2588 }
0x17fe   :  { %1171 = vrot.lane.b32.xlu0 %v2589_v21, %s2719_s17 }
0x1870   :  { %v1172_v22 = vpop.permute.xlu0 %1171 }
0x1871   :  { %v1174_v23 = vmul.f32 %v2587_v13, %v1172_v22 }
0x1873   :  { %1176 = vrot.lane.b32.xlu1 %v1174_v23, %s2720_s18 }
0x18e5   :  { %v1177_v24 = vpop.permute.xlu1 %1176 }
0x18e6   :  { %1179 = vst.msk [vmem:[#allocation3] sm:$0x3] %vm242_vm2, %v1177_v24  ;;  %2311 = vmatmul.mubr.msk.f32.vlgmr.msra.gmra.mrb[10].mxu1 %vm43_vm0, %v1177_v24  ;;  %v1492_v24 = vld [vmem:[#allocation2 + $0x8] sm:$0x3] }
0x18e7   :  { %2474 = vmatpush3.bf16.msra.mxu1 %v2958_v57  ;;  %2332 = vmatprep.mubr.msk.f32.mxu1 %vm2717_vm1, %v2718_v11 }
0x18e8   :  { %2475 = vmatprep.subr.bf16.mxu1 %v2716_v6 }
0x18eb   :  { %2477 = vmatpush3.bf16.msra.mxu1 %v2964_v12 }
0x18ec   :  { %2484 = vmatprep.subr.bf16.mxu1 %v2716_v6 }
0x19b9   :  { %v1249_v26 = vpop.f32.mrb[10].mxu1 }
0x19ba   :  { %v1253_v27 = vadd.f32 %v1249_v26, %v1180_v25  ;;  %v2312_v28 = vpop.f32.mrb[11].mxu1 }
0x19bc   :  { %v1254_v29 = vadd.f32 %v2989_v2, %v1253_v27 }
0x19be   :  { %2590 = vtanh.f32 %v1254_v29  ;;  %v2069_v31 = vmul.f32 -1.442695, %v1254_v29 }
0x19c0   :  { %2592 = vpow2.f32 %v2069_v31 }
0x19c8   :  { %v2591_v30 = vpop.eup %2590 }
0x19c9   :  { %1264 = vrot.lane.b32.xlu0 %v2591_v30, %s2719_s17 }
0x19ca   :  { %v2593_v32 = vpop.eup %2592 }
0x19cb   :  { %v1258_v33 = vadd.f32 1.0, %v2593_v32 }
0x19cd   :  { %2594 = vrcp.f32 %v1258_v33 }
0x19d7   :  { %v2595_v34 = vpop.eup %2594 }
0x19d8   :  { %v1262_v37 = vmul.f32 %v2595_v34, %v1168_v19 }
0x1a3b   :  { %v1265_v35 = vpop.permute.xlu0 %1264 }
0x1a3c   :  { %v1267_v36 = vmul.f32 %v2595_v34, %v1265_v35 }
0x1a3e   :  { %1269 = vrot.lane.b32.xlu1 %v1267_v36, %s2720_s18 }
0x1ab0   :  { %v1270_v38 = vpop.permute.xlu1 %1269 }
0x1ab1   :  { %v1272_v39 = vadd.f32 %v1270_v38, %v1262_v37 }
0x1ab3   :  { %2596 = vtanh.f32 %v1272_v39 }
0x1abd   :  { %v2597_v40 = vpop.eup %2596 }
0x1abe   :  { %1275 = vrot.lane.b32.xlu0 %v2597_v40, %s2719_s17 }
0x1b30   :  { %v1276_v41 = vpop.permute.xlu0 %1275 }
0x1b31   :  { %v1278_v42 = vmul.f32 %v2595_v34, %v1276_v41 }
0x1b33   :  { %1280 = vrot.lane.b32.xlu1 %v1278_v42, %s2720_s18 }
0x1ba5   :  { %v1281_v43 = vpop.permute.xlu1 %1280 }
0x1ba6   :  { %1283 = vst.msk [vmem:[#allocation3 + $0x2] sm:$0x3] %vm242_vm2, %v1281_v43  ;;  %2322 = vmatmul.mubr.msk.f32.vlgmr.msra.gmra.mrb[12].mxu0 %vm43_vm0, %v1281_v43  ;;  %v1596_v43 = vld [vmem:[#allocation2 + $0xa] sm:$0x3] }
0x1ba7   :  { %2480 = vmatpush3.bf16.msra.mxu0 %v2958_v57  ;;  %2343 = vmatprep.mubr.msk.f32.mxu0 %vm2717_vm1, %v2718_v11 }
0x1ba8   :  { %2481 = vmatprep.subr.bf16.mxu0 %v2716_v6 }
0x1bab   :  { %2483 = vmatpush3.bf16.msra.mxu0 %v2964_v12 }
0x1bac   :  { %2490 = vmatprep.subr.bf16.mxu0 %v2716_v6 }
0x1c79   :  { %v1353_v45 = vpop.f32.mrb[12].mxu0 }
0x1c7a   :  { %v1357_v46 = vadd.f32 %v1353_v45, %v1284_v44  ;;  %v2323_v20 = vpop.f32.mrb[13].mxu0 }
0x1c7c   :  { %v1358_v48 = vadd.f32 %v2989_v2, %v1357_v46 }
0x1c7e   :  { %2598 = vtanh.f32 %v1358_v48  ;;  %v2071_v50 = vmul.f32 -1.442695, %v1358_v48 }
0x1c80   :  { %2600 = vpow2.f32 %v2071_v50 }
0x1c88   :  { %v2599_v49 = vpop.eup %2598 }
0x1c89   :  { %1368 = vrot.lane.b32.xlu0 %v2599_v49, %s2719_s17 }
0x1c8a   :  { %v2601_v51 = vpop.eup %2600 }
0x1c8b   :  { %v1362_v52 = vadd.f32 1.0, %v2601_v51 }
0x1c8d   :  { %2602 = vrcp.f32 %v1362_v52 }
0x1c97   :  { %v2603_v53 = vpop.eup %2602 }
0x1c98   :  { %v1366_v56 = vmul.f32 %v2603_v53, %v1272_v39 }
0x1cfb   :  { %v1369_v54 = vpop.permute.xlu0 %1368 }
0x1cfc   :  { %v1371_v55 = vmul.f32 %v2603_v53, %v1369_v54 }
0x1cfe   :  { %1373 = vrot.lane.b32.xlu1 %v1371_v55, %s2720_s18 }
0x1d70   :  { %v1374_v58 = vpop.permute.xlu1 %1373 }
0x1d71   :  { %v1376_v59 = vadd.f32 %v1374_v58, %v1366_v56 }
0x1d73   :  { %2604 = vtanh.f32 %v1376_v59 }
0x1d7d   :  { %v2605_v60 = vpop.eup %2604 }
0x1d7e   :  { %1379 = vrot.lane.b32.xlu0 %v2605_v60, %s2719_s17 }
0x1df0   :  { %v1380_v61 = vpop.permute.xlu0 %1379 }
0x1df1   :  { %v1382_v62 = vmul.f32 %v2603_v53, %v1380_v61  ;;  %v1700_v61 = vld [vmem:[#allocation2 + $0xc] sm:$0x3] }
0x1df3   :  { %1384 = vrot.lane.b32.xlu1 %v1382_v62, %s2720_s18 }
0x1e65   :  { %v1385_v63 = vpop.permute.xlu1 %1384 }
0x1e66   :  { %1387 = vst.msk [vmem:[#allocation3 + $0x4] sm:$0x3] %vm242_vm2, %v1385_v63  ;;  %2333 = vmatmul.mubr.msk.f32.vlgmr.msra.gmra.mrb[12].mxu1 %vm43_vm0, %v1385_v63 }
0x1e67   :  { %2486 = vmatpush3.bf16.msra.mxu1 %v2958_v57  ;;  %2354 = vmatprep.mubr.msk.f32.mxu1 %vm2717_vm1, %v2718_v11 }
0x1e68   :  { %2487 = vmatprep.subr.bf16.mxu1 %v2716_v6 }
0x1e6b   :  { %2489 = vmatpush3.bf16.msra.mxu1 %v2964_v12 }
0x1e6c   :  { %2496 = vmatprep.subr.bf16.mxu1 %v2716_v6 }
0x1f39   :  { %v1457_v14 = vpop.f32.mrb[12].mxu1 }
0x1f3a   :  { %v1461_v1 = vadd.f32 %v1457_v14, %v1388_v0  ;;  %v2334_v3 = vpop.f32.mrb[13].mxu1 }
0x1f3c   :  { %v1462_v4 = vadd.f32 %v2989_v2, %v1461_v1 }
0x1f3e   :  { %2606 = vtanh.f32 %v1462_v4  ;;  %v2073_v7 = vmul.f32 -1.442695, %v1462_v4 }
0x1f40   :  { %2608 = vpow2.f32 %v2073_v7 }
0x1f48   :  { %v2607_v5 = vpop.eup %2606 }
0x1f49   :  { %1472 = vrot.lane.b32.xlu0 %v2607_v5, %s2719_s17 }
0x1f4a   :  { %v2609_v8 = vpop.eup %2608 }
0x1f4b   :  { %v1466_v9 = vadd.f32 1.0, %v2609_v8 }
0x1f4d   :  { %2610 = vrcp.f32 %v1466_v9 }
0x1f57   :  { %v2611_v10 = vpop.eup %2610 }
0x1f58   :  { %v1470_v16 = vmul.f32 %v2611_v10, %v1376_v59 }
0x1fbb   :  { %v1473_v13 = vpop.permute.xlu0 %1472 }
0x1fbc   :  { %v1475_v15 = vmul.f32 %v2611_v10, %v1473_v13 }
0x1fbe   :  { %1477 = vrot.lane.b32.xlu1 %v1475_v15, %s2720_s18 }
0x2030   :  { %v1478_v17 = vpop.permute.xlu1 %1477 }
0x2031   :  { %v1480_v18 = vadd.f32 %v1478_v17, %v1470_v16 }
0x2033   :  { %2612 = vtanh.f32 %v1480_v18 }
0x203d   :  { %v2613_v19 = vpop.eup %2612 }
0x203e   :  { %1483 = vrot.lane.b32.xlu0 %v2613_v19, %s2719_s17  ;;  %v1804_v19 = vld [vmem:[#allocation2 + $0xe] sm:$0x3] }
0x20b0   :  { %v1484_v21 = vpop.permute.xlu0 %1483 }
0x20b1   :  { %v1486_v22 = vmul.f32 %v2611_v10, %v1484_v21 }
0x20b3   :  { %1488 = vrot.lane.b32.xlu1 %v1486_v22, %s2720_s18 }
0x2125   :  { %v1489_v23 = vpop.permute.xlu1 %1488 }
0x2126   :  { %1491 = vst.msk [vmem:[#allocation3 + $0x6] sm:$0x3] %vm242_vm2, %v1489_v23  ;;  %2344 = vmatmul.mubr.msk.f32.vlgmr.msra.gmra.mrb[14].mxu0 %vm43_vm0, %v1489_v23 }
0x2127   :  { %2492 = vmatpush3.bf16.msra.mxu0 %v2958_v57  ;;  %2365 = vmatprep.mubr.msk.f32.mxu0 %vm2717_vm1, %v2718_v11 }
0x2128   :  { %2493 = vmatprep.subr.bf16.mxu0 %v2716_v6 }
0x212b   :  { %2495 = vmatpush3.bf16.msra.mxu0 %v2964_v12 }
0x212c   :  { %2502 = vmatprep.subr.bf16.mxu0 %v2716_v6 }
0x21f9   :  { %v1561_v25 = vpop.f32.mrb[14].mxu0 }
0x21fa   :  { %v1565_v26 = vadd.f32 %v1561_v25, %v1492_v24  ;;  %v2345_v27 = vpop.f32.mrb[15].mxu0 }
0x21fc   :  { %v1566_v28 = vadd.f32 %v2989_v2, %v1565_v26 }
0x21fe   :  { %2614 = vtanh.f32 %v1566_v28  ;;  %v2075_v30 = vmul.f32 -1.442695, %v1566_v28 }
0x2200   :  { %2616 = vpow2.f32 %v2075_v30 }
0x2208   :  { %v2615_v29 = vpop.eup %2614 }
0x2209   :  { %1576 = vrot.lane.b32.xlu0 %v2615_v29, %s2719_s17 }
0x220a   :  { %v2617_v31 = vpop.eup %2616 }
0x220b   :  { %v1570_v32 = vadd.f32 1.0, %v2617_v31 }
0x220d   :  { %2618 = vrcp.f32 %v1570_v32 }
0x2217   :  { %v2619_v33 = vpop.eup %2618 }
0x2218   :  { %v1574_v36 = vmul.f32 %v2619_v33, %v1480_v18 }
0x227b   :  { %v1577_v34 = vpop.permute.xlu0 %1576 }
0x227c   :  { %v1579_v35 = vmul.f32 %v2619_v33, %v1577_v34 }
0x227e   :  { %1581 = vrot.lane.b32.xlu1 %v1579_v35, %s2720_s18  ;;  %v1917_v35 = vld [vmem:[%s3145_s7 + $0x8] sm:$0xff] }
0x22f0   :  { %v1582_v37 = vpop.permute.xlu1 %1581 }
0x22f1   :  { %v1584_v38 = vadd.f32 %v1582_v37, %v1574_v36  ;;  %v1918_v36 = vld [vmem:[%s3145_s7 + $0x10] sm:$0xff] }
0x22f3   :  { %2620 = vtanh.f32 %v1584_v38 }
0x22fd   :  { %v2621_v39 = vpop.eup %2620 }
0x22fe   :  { %1587 = vrot.lane.b32.xlu0 %v2621_v39, %s2719_s17 }
0x2370   :  { %v1588_v40 = vpop.permute.xlu0 %1587 }
0x2371   :  { %v1590_v41 = vmul.f32 %v2619_v33, %v1588_v40 }
0x2373   :  { %1592 = vrot.lane.b32.xlu1 %v1590_v41, %s2720_s18 }
0x23e5   :  { %v1593_v42 = vpop.permute.xlu1 %1592 }
0x23e6   :  { %1595 = vst.msk [vmem:[#allocation3 + $0x8] sm:$0x3] %vm242_vm2, %v1593_v42  ;;  %2355 = vmatmul.mubr.msk.f32.vlgmr.msra.gmra.mrb[14].mxu1 %vm43_vm0, %v1593_v42 }
0x23e7   :  { %2498 = vmatpush3.bf16.msra.mxu1 %v2958_v57  ;;  %2376 = vmatprep.mubr.msk.f32.mxu1 %vm2717_vm1, %v2718_v11 }
0x23e8   :  { %2499 = vmatprep.subr.bf16.mxu1 %v2716_v6 }
0x23eb   :  { %2501 = vmatpush3.bf16.msra.mxu1 %v2964_v12 }
0x24b9   :  { %v1665_v44 = vpop.f32.mrb[14].mxu1 }
0x24ba   :  { %v1669_v45 = vadd.f32 %v1665_v44, %v1596_v43  ;;  %v2356_v46 = vpop.f32.mrb[15].mxu1 }
0x24bc   :  { %v1670_v20 = vadd.f32 %v2989_v2, %v1669_v45 }
0x24be   :  { %2622 = vtanh.f32 %v1670_v20  ;;  %v2077_v49 = vmul.f32 -1.442695, %v1670_v20 }
0x24c0   :  { %2624 = vpow2.f32 %v2077_v49 }
0x24c8   :  { %v2623_v48 = vpop.eup %2622 }
0x24c9   :  { %1680 = vrot.lane.b32.xlu0 %v2623_v48, %s2719_s17 }
0x24ca   :  { %v2625_v57 = vpop.eup %2624 }
0x24cb   :  { %v1674_v50 = vadd.f32 1.0, %v2625_v57 }
0x24cd   :  { %2626 = vrcp.f32 %v1674_v50 }
0x24d7   :  { %v2627_v51 = vpop.eup %2626 }
0x24d8   :  { %v1678_v12 = vmul.f32 %v2627_v51, %v1584_v38  ;;  %v1919_v38 = vld [vmem:[%s3145_s7 + $0x18] sm:$0xff] }
0x24d9   :  { %v2506_v39 = vpack.c.bf16 %v1919_v38, %v1918_v36 }
0x253b   :  { %v1681_v52 = vpop.permute.xlu0 %1680 }
0x253c   :  { %v1683_v53 = vmul.f32 %v2627_v51, %v1681_v52 }
0x253e   :  { %1685 = vrot.lane.b32.xlu1 %v1683_v53, %s2720_s18 }
0x25b0   :  { %v1686_v54 = vpop.permute.xlu1 %1685 }
0x25b1   :  { %v1688_v55 = vadd.f32 %v1686_v54, %v1678_v12 }
0x25b3   :  { %2628 = vtanh.f32 %v1688_v55 }
0x25bd   :  { %v2629_v56 = vpop.eup %2628 }
0x25be   :  { %1691 = vrot.lane.b32.xlu0 %v2629_v56, %s2719_s17 }
0x2630   :  { %v1692_v58 = vpop.permute.xlu0 %1691 }
0x2631   :  { %v1694_v59 = vmul.f32 %v2627_v51, %v1692_v58 }
0x2633   :  { %1696 = vrot.lane.b32.xlu1 %v1694_v59, %s2720_s18 }
0x26a5   :  { %v1697_v60 = vpop.permute.xlu1 %1696 }
0x26a6   :  { %1699 = vst.msk [vmem:[#allocation3 + $0xa] sm:$0x3] %vm242_vm2, %v1697_v60  ;;  %2366 = vmatmul.mubr.msk.f32.vlgmr.msra.gmra.mrb[16].mxu0 %vm43_vm0, %v1697_v60 }
0x26a7   :  { %2387 = vmatprep.mubr.msk.f32.mxu0 %vm2717_vm1, %v2718_v11 }
0x2779   :  { %v1769_v62 = vpop.f32.mrb[16].mxu0 }
0x277a   :  { %v1773_v63 = vadd.f32 %v1769_v62, %v1700_v61  ;;  %v2367_v0 = vpop.f32.mrb[17].mxu0 }
0x277c   :  { %v1774_v14 = vadd.f32 %v2989_v2, %v1773_v63 }
0x277e   :  { %2630 = vtanh.f32 %v1774_v14  ;;  %v2079_v3 = vmul.f32 -1.442695, %v1774_v14 }
0x2780   :  { %2632 = vpow2.f32 %v2079_v3 }
0x2788   :  { %v2631_v1 = vpop.eup %2630 }
0x2789   :  { %1784 = vrot.lane.b32.xlu0 %v2631_v1, %s2719_s17 }
0x278a   :  { %v2633_v4 = vpop.eup %2632 }
0x278b   :  { %v1778_v5 = vadd.f32 1.0, %v2633_v4 }
0x278d   :  { %2634 = vrcp.f32 %v1778_v5 }
0x2797   :  { %v2635_v7 = vpop.eup %2634 }
0x2798   :  { %v1782_v11 = vmul.f32 %v2635_v7, %v1688_v55 }
0x27fb   :  { %v1785_v8 = vpop.permute.xlu0 %1784 }
0x27fc   :  { %v1787_v9 = vmul.f32 %v2635_v7, %v1785_v8 }
0x27fe   :  { %1789 = vrot.lane.b32.xlu1 %v1787_v9, %s2720_s18 }
0x2870   :  { %v1790_v10 = vpop.permute.xlu1 %1789 }
0x2871   :  { %v1792_v13 = vadd.f32 %v1790_v10, %v1782_v11 }
0x2873   :  { %2636 = vtanh.f32 %v1792_v13 }
0x287d   :  { %v2637_v15 = vpop.eup %2636 }
0x287e   :  { %1795 = vrot.lane.b32.xlu0 %v2637_v15, %s2719_s17 }
0x28f0   :  { %v1796_v16 = vpop.permute.xlu0 %1795 }
0x28f1   :  { %v1798_v17 = vmul.f32 %v2635_v7, %v1796_v16 }
0x28f3   :  { %1800 = vrot.lane.b32.xlu1 %v1798_v17, %s2720_s18 }
0x2965   :  { %v1801_v18 = vpop.permute.xlu1 %1800 }
0x2966   :  { %1803 = vst.msk [vmem:[#allocation3 + $0xc] sm:$0x3] %vm242_vm2, %v1801_v18  ;;  %2377 = vmatmul.mubr.msk.f32.vlgmr.msra.gmra.mrb[16].mxu1 %vm43_vm0, %v1801_v18 }
0x2a39   :  { %v1873_v21 = vpop.f32.mrb[16].mxu1 }
0x2a3a   :  { %v1877_v22 = vadd.f32 %v1873_v21, %v1804_v19  ;;  %v2378_v23 = vpop.f32.mrb[17].mxu1 }
0x2a3c   :  { %v1878_v24 = vadd.f32 %v2989_v2, %v1877_v22  ;;  %v1916_v2 = vld [vmem:[%s3145_s7] sm:$0xff]  ;;  %s2722_s7 = smov [#allocation6]  }
0x2a3d   :  { %v2503_v37 = vpack.c.bf16 %v1917_v35, %v1916_v2 }
0x2a3e   :  { %2638 = vtanh.f32 %v1878_v24  ;;  %v2081_v26 = vmul.f32 -1.442695, %v1878_v24 }
0x2a3f   :  { %2504 = vmatpush3.bf16.msra.mxu0 %v2503_v37 }
0x2a40   :  { %2640 = vpow2.f32 %v2081_v26  ;;  %2505 = vmatprep.subr.bf16.mxu0 %v2716_v6 }
0x2a43   :  { %2507 = vmatpush3.bf16.msra.mxu0 %v2506_v39 }
0x2a48   :  { %v2639_v25 = vpop.eup %2638 }
0x2a49   :  { %1888 = vrot.lane.b32.xlu0 %v2639_v25, %s2719_s17 }
0x2a4a   :  { %v2641_v27 = vpop.eup %2640 }
0x2a4b   :  { %v1882_v28 = vadd.f32 1.0, %v2641_v27 }
0x2a4d   :  { %2642 = vrcp.f32 %v1882_v28 }
0x2a57   :  { %v2643_v29 = vpop.eup %2642 }
0x2a58   :  { %v1886_v32 = vmul.f32 %v2643_v29, %v1792_v13 }
0x2abb   :  { %v1889_v30 = vpop.permute.xlu0 %1888 }
0x2abc   :  { %v1891_v31 = vmul.f32 %v2643_v29, %v1889_v30 }
0x2abe   :  { %1893 = vrot.lane.b32.xlu1 %v1891_v31, %s2720_s18 }
0x2b30   :  { %v1894_v33 = vpop.permute.xlu1 %1893 }
0x2b31   :  { %v1896_v34 = vadd.f32 %v1894_v33, %v1886_v32 }
0x2b33   :  { %2644 = vtanh.f32 %v1896_v34 }
0x2b3d   :  { %v2645_v40 = vpop.eup %2644 }
0x2b3e   :  { %1899 = vrot.lane.b32.xlu0 %v2645_v40, %s2719_s17  ;;  %s2016_s17 = sshll.u32 %s2722_s7, 4  ;;  %s2017_s17 = int_to_ptr.vmem [resolvable:$true] %s2016_s17 }
0x2b3f   :  { %s2646_s21 = scalar_lea.vmem %s2017_s17, 64  ;;  %p2651_p1 = scmp.lt.s32.totalorder %s2017_s17, %s2017_s17 }
0x2b40   :  { %p2647_p0 = scmp.ne.s32.totalorder %s2017_s17, %s2646_s21  ;;  %p2652_p2 = scmp.lt.s32.totalorder %s2646_s21, %s2646_s21 }
0x2b42   :  { %974 = vrot.lane.b32.xlu0 %v2932_v47, %s2721_s20  ;;  %p2653_p3 = por %p2652_p2, %p2651_p1 }
0x2b44   :  { %p2654_p4 = pnand %p2653_p3, %p2647_p0 }
0x2bb0   :  { %v1900_v41 = vpop.permute.xlu0 %1899 }
0x2bb1   :  { %v1902_v42 = vmul.f32 %v2643_v29, %v1900_v41 }
0x2bb3   :  { %1904 = vrot.lane.b32.xlu1 %v1902_v42, %s2720_s18 }
0x2bb4   :  { %v975_v43 = vpop.permute.xlu0 %974 }
0x2bb5   :  { %977 = vst.msk [vmem:[#allocation8] sm:$0x3] %vm242_vm2, %v975_v43 }
0x2bb7   :  { %1911 = vrot.lane.b32.xlu1 %v1896_v34, %s2721_s20 }
0x2c25   :  { %v1905_v44 = vpop.permute.xlu1 %1904 }
0x2c26   :  { %1907 = vst.msk [vmem:[#allocation3 + $0xe] sm:$0x3] %vm242_vm2, %v1905_v44  ;;  %1909 = vst.msk [vmem:[#allocation6 + $0x2] sm:$0x3] %vm242_vm2, %v1905_v44  ;;  %2388 = vmatmul.mubr.msk.f32.vlgmr.msra.gmra.mrb[18].mxu0 %vm43_vm0, %v1905_v44 }
0x2c29   :  { %v1912_v6 = vpop.permute.xlu1 %1911 }
0x2c2a   :  { %1915 = vst.msk [vmem:[#allocation8 + $0x2] sm:$0x3] %vm242_vm2, %v1912_v6 }
0x2c2b   :  { %2657 = shalt.err (!%p2654_p4)
}
0x2c2c   :  { %s2658_s24 = scalar_lea.hbm %s3148_s10, 64 }
0x2c2d   :  { %p2659_p5 = scmp.ne.s32.totalorder %s3148_s10, %s2658_s24  ;;  %p2662_p6 = scmp.lt.u32.totalorder %s2658_s24, %s3148_s10 }
0x2c2f   :  { %p2664_p7 = pnand %p2662_p6, %p2659_p5 }
0x2c31   :  { %2667 = shalt.err (!%p2664_p7)
}
0x2c32   :  { %s2723_s29 = smov 2   ;;  %s2724_s4 = smov [#allocation8]  }
0x2c33   :  { %2022 = dma.vmem_to_hbm [thread:$0]  %s2017_s17, 64, %s3148_s10, [#allocation7], %s2720_s18, %s2720_s18, %s2723_s29  }
0x2c34   :  { %s2028_s1 = sshll.u32 %s2724_s4, 4  ;;  %s2029_s1 = int_to_ptr.vmem [resolvable:$true] %s2028_s1 }
0x2c35   :  { %s2668_s5 = scalar_lea.vmem %s2029_s1, 64  ;;  %p2673_p9 = scmp.lt.s32.totalorder %s2029_s1, %s2029_s1 }
0x2c36   :  { %p2669_p8 = scmp.ne.s32.totalorder %s2029_s1, %s2668_s5  ;;  %p2674_p10 = scmp.lt.s32.totalorder %s2668_s5, %s2668_s5 }
0x2c38   :  { %p2675_p11 = por %p2674_p10, %p2673_p9 }
0x2c3a   :  { %p2676_p12 = pnand %p2675_p11, %p2669_p8 }
0x2c3c   :  { %2679 = shalt.err (!%p2676_p12)
}
0x2c3d   :  { %s2680_s14 = scalar_lea.hbm %s3149_s11, 64 }
0x2c3e   :  { %p2681_p13 = scmp.ne.s32.totalorder %s3149_s11, %s2680_s14  ;;  %p2684_p0 = scmp.lt.u32.totalorder %s2680_s14, %s3149_s11 }
0x2c40   :  { %p2686_p1 = pnand %p2684_p0, %p2681_p13 }
0x2c42   :  { %2689 = shalt.err (!%p2686_p1)
}
0x2c43   :  { %2034 = dma.vmem_to_hbm [thread:$0]  %s2029_s1, 64, %s3149_s11, [#allocation7], %s2720_s18, %s2720_s18, %s2723_s29   ;;  %vm1999_vm3 = vcmask 123904  }
0x2c44   :  { %v2082_v47 = vld [vmem:[%s3146_s8] ss:$0 sm:$0xff]  ;;  %s2725_s7 = smov [#allocation4]  }
0x2c45   :  { %s2007_s17 = sshll.u32 %s2725_s7, 4  ;;  %s2008_s17 = int_to_ptr.vmem [resolvable:$true] %s2007_s17 }
0x2c46   :  { %s2690_s21 = scalar_lea.vmem %s2008_s17, 32  ;;  %p2695_p3 = scmp.lt.s32.totalorder %s2008_s17, %s2008_s17 }
0x2c47   :  { %p2691_p2 = scmp.ne.s32.totalorder %s2008_s17, %s2690_s21  ;;  %p2696_p4 = scmp.lt.s32.totalorder %s2690_s21, %s2690_s21 }
0x2c49   :  { %p2697_p5 = por %p2696_p4, %p2695_p3 }
0x2c4b   :  { %p2698_p6 = pnand %p2697_p5, %p2691_p2 }
0x2cf9   :  { %v1995_v45 = vpop.f32.mrb[18].mxu0 }
0x2cfa   :  { %v1996_v46 = vadd.f32 %v2082_v47, %v1995_v45  ;;  %v2389_v20 = vpop.f32.mrb[19].mxu0 }
0x2cfc   :  { %2000 = vst.msk [vmem:[#allocation4] sm:$0x3] %vm1999_vm3, %v1996_v46 }
0x2cfd   :  { %2701 = shalt.err (!%p2698_p6)
}
0x2cfe   :  { %s2702_s22 = scalar_lea.hbm %s3147_s9, 32 }
0x2cff   :  { %p2703_p7 = scmp.ne.s32.totalorder %s3147_s9, %s2702_s22  ;;  %p2706_p8 = scmp.lt.u32.totalorder %s2702_s22, %s3147_s9 }
0x2d01   :  { %p2708_p9 = pnand %p2706_p8, %p2703_p7 }
0x2d03   :  { %2711 = shalt.err (!%p2708_p9)
}
0x2d04   :  { %2010 = dma.vmem_to_hbm [thread:$0]  %s2008_s17, 32, %s3147_s9, [#allocation5]  }
0x2d05   :  { %2712 = dma.done.wait [#allocation5], 32  }
0x2d06   :  { %2713 = vsyncadd [#allocation5], 4294967264 }
0x2d07   :  { %2714 = dma.done.wait [#allocation7], 128  }
0x2d08   :  { %2715 = vsyncadd [#allocation7], 4294967168 }
0x2d09   :  { %2044 = vsyncpa [#allocation5], 1 }
0x2d0a   :  { %2045 = vsyncpa [#allocation7], 1 }

</bundles_post_ra>
